<compile_context>
chip_gen: v7x
topology: tpu7x:2x2x1
jax: 0.10.0
libtpu: 0.0.40
codegen_flags: <defaults>
</compile_context>

<pallas_src>
import functools

import jax
import jax.numpy as jnp
from jax.experimental import pallas as pl
from jax.experimental.pallas import tpu as pltpu


_VMEM_LIMIT = 32 * 1024 * 1024  # explicit scoped-VMEM budget (safe on v5e/v6e/v7x)


# ----------------------------- Pallas kernels -----------------------------

def _conv3x3_taps(x_ref, w_ref, wp, m):
    """Sum of the 9 taps of a padding-1 3x3 conv on a row-flattened slab.

    x_ref: (S, Cin) f32 slab (padded image, rows flattened as h*wp + w).
    w_ref: (9, Cin, Cout) bf16, BN scale folded, tap index t = kh*3 + kw.
    Returns (m, Cout) f32.
    """
    acc = None
    for kh in range(3):
        for kw in range(3):
            off = kh * wp + kw                                   # static
            xw = x_ref[pl.ds(off, m), :].astype(jnp.bfloat16)    # (m, Cin)
            p = jnp.dot(xw, w_ref[kh * 3 + kw],
                        preferred_element_type=jnp.float32)      # (m, Cout) f32
            acc = p if acc is None else acc + p
    return acc


def _conv_bn_relu_kernel(x_ref, w_ref, b_ref, o_ref, *, wp, m):
    """o = relu(conv3x3(x) * bn_scale + bn_bias)  (scale pre-folded into w)."""
    acc = _conv3x3_taps(x_ref, w_ref, wp, m)
    o_ref[...] = jnp.maximum(acc + b_ref[...], 0.0).astype(o_ref.dtype)


def _conv_bn_proj_add_relu_kernel(y_ref, w_ref, b_ref, xs_ref, ws_ref, bs_ref,
                                  o_ref, *, wp, m):
    """o = relu(bn2(conv3x3(y)) + bn_sc(conv1x1(x_sc)))  -- shortcut fused."""
    acc = _conv3x3_taps(y_ref, w_ref, wp, m) + b_ref[...]
    sc = jnp.dot(xs_ref[...], ws_ref[...],
                 preferred_element_type=jnp.float32) + bs_ref[...]
    o_ref[...] = jnp.maximum(acc + sc, 0.0).astype(o_ref.dtype)


def _conv_bn_id_add_relu_kernel(y_ref, w_ref, b_ref, r_ref, o_ref, *, wp, m):
    """o = relu(bn2(conv3x3(y)) + residual)  -- identity shortcut fused."""
    acc = _conv3x3_taps(y_ref, w_ref, wp, m) + b_ref[...]
    o_ref[...] = jnp.maximum(acc + r_ref[...], 0.0).astype(o_ref.dtype)


# --------------------------- pallas_call wrappers --------------------------

def _compiler_params():
    return pltpu.CompilerParams(
        dimension_semantics=("parallel",),
        vmem_limit_bytes=_VMEM_LIMIT)


def _conv1_call(x_slab, w, b, *, wp, m):
    n, s, cin = x_slab.shape
    cout = w.shape[-1]
    kernel = functools.partial(_conv_bn_relu_kernel, wp=wp, m=m)
    return pl.pallas_call(
        kernel,
        out_shape=jax.ShapeDtypeStruct((n, m, cout), jnp.float32),
        grid_spec=pltpu.PrefetchScalarGridSpec(
            num_scalar_prefetch=0,
            grid=(n,),
            in_specs=[
                pl.BlockSpec((None, s, cin), lambda i: (i, 0, 0)),
                pl.BlockSpec((9, cin, cout), lambda i: (0, 0, 0)),   # grid-invariant
                pl.BlockSpec((1, cout), lambda i: (0, 0)),           # grid-invariant
            ],
            out_specs=pl.BlockSpec((None, m, cout), lambda i: (i, 0, 0)),
        ),
        compiler_params=_compiler_params(),
    )(x_slab, w, b)


def _conv2_proj_call(y_slab, w, b, xs_slab, wsc, bsc, *, wp, m):
    n, s, cout = y_slab.shape
    cin = xs_slab.shape[-1]
    kernel = functools.partial(_conv_bn_proj_add_relu_kernel, wp=wp, m=m)
    return pl.pallas_call(
        kernel,
        out_shape=jax.ShapeDtypeStruct((n, m, cout), jnp.float32),
        grid_spec=pltpu.PrefetchScalarGridSpec(
            num_scalar_prefetch=0,
            grid=(n,),
            in_specs=[
                pl.BlockSpec((None, s, cout), lambda i: (i, 0, 0)),
                pl.BlockSpec((9, cout, cout), lambda i: (0, 0, 0)),
                pl.BlockSpec((1, cout), lambda i: (0, 0)),
                pl.BlockSpec((None, m, cin), lambda i: (i, 0, 0)),
                pl.BlockSpec((cin, cout), lambda i: (0, 0)),
                pl.BlockSpec((1, cout), lambda i: (0, 0)),
            ],
            out_specs=pl.BlockSpec((None, m, cout), lambda i: (i, 0, 0)),
        ),
        compiler_params=_compiler_params(),
    )(y_slab, w, b, xs_slab, wsc, bsc)


def _conv2_id_call(y_slab, w, b, res, *, wp, m):
    n, s, cout = y_slab.shape
    kernel = functools.partial(_conv_bn_id_add_relu_kernel, wp=wp, m=m)
    return pl.pallas_call(
        kernel,
        out_shape=jax.ShapeDtypeStruct((n, m, cout), jnp.float32),
        grid_spec=pltpu.PrefetchScalarGridSpec(
            num_scalar_prefetch=0,
            grid=(n,),
            in_specs=[
                pl.BlockSpec((None, s, cout), lambda i: (i, 0, 0)),
                pl.BlockSpec((9, cout, cout), lambda i: (0, 0, 0)),
                pl.BlockSpec((1, cout), lambda i: (0, 0)),
                pl.BlockSpec((None, m, cout), lambda i: (i, 0, 0)),
            ],
            out_specs=pl.BlockSpec((None, m, cout), lambda i: (i, 0, 0)),
        ),
        compiler_params=_compiler_params(),
    )(y_slab, w, b, res)


# ------------------------------ glue (JAX) --------------------------------

def _fold_bn(gamma, beta, mean, var, eps):
    scale = gamma / jnp.sqrt(var + eps)
    bias = (beta - mean * scale).reshape(1, -1).astype(jnp.float32)
    return scale, bias


def _fold_w3x3(w_oihw, scale):
    """(Cout, Cin, 3, 3) -> (9, Cin, Cout) bf16 with BN scale folded in."""
    w = jnp.transpose(w_oihw, (2, 3, 1, 0))                    # (3, 3, Cin, Cout)
    w = w.reshape(9, w.shape[2], w.shape[3]) * scale.reshape(1, 1, -1)
    return w.astype(jnp.bfloat16)


def _fold_w1x1(w_oihw, scale):
    """(Cout, Cin, 1, 1) -> (Cin, Cout) bf16 with BN scale folded in."""
    w = jnp.transpose(w_oihw[:, :, 0, 0], (1, 0)) * scale.reshape(1, -1)
    return w.astype(jnp.bfloat16)


def _pad_slab(x_nhwc):
    """NHWC -> row-flattened slab for a padding-1 3x3 conv.

    Pads H by (1, 2) and W by (1, 1), flattens (H, W).  Tap (kh, kw) of the
    conv then reads rows [kh*Wp + kw, kh*Wp + kw + H*Wp) of the slab; the
    extra bottom row keeps the largest tap slice in bounds.  Rows whose
    w-coordinate >= W are garbage and get sliced off after the kernel.
    """
    n, h, w, c = x_nhwc.shape
    xp = jnp.pad(x_nhwc, ((0, 0), (1, 2), (1, 1), (0, 0)))
    wp = w + 2
    return xp.reshape(n, (h + 3) * wp, c), wp, h * wp


def basic_block_forward(x_nchw, params, stride=1, eps=1e-5):
    """ResNet BasicBlock forward (eval-mode BatchNorm folded into the convs)."""
    x = jnp.transpose(x_nchw, (0, 2, 3, 1)).astype(jnp.float32)     # NHWC
    n, h, w, cin = x.shape
    cout = params["w1"].shape[0]

    # --- conv1 (3x3, padding=1) + BN + ReLU, computed densely at stride 1 ---
    s1, b1 = _fold_bn(*params["bn1"], eps)
    w1 = _fold_w3x3(params["w1"], s1)
    x_slab, wp1, m1 = _pad_slab(x)
    y1 = _conv1_call(x_slab, w1, b1, wp=wp1, m=m1)                  # (n, m1, cout)
    y1 = y1.reshape(n, h, wp1, cout)[:, :, :w, :]                   # drop garbage cols
    if stride != 1:
        # TODO(synk): strided first conv is computed densely then subsampled
        # (~stride^2 extra MACs); an in-kernel strided window would avoid it.
        y1 = y1[:, ::stride, ::stride, :]
    ho, wo = y1.shape[1], y1.shape[2]

    # --- conv2 (3x3, stride 1, padding 1) + BN, fused with shortcut + ReLU ---
    s2, b2 = _fold_bn(*params["bn2"], eps)
    w2 = _fold_w3x3(params["w2"], s2)
    y_slab, wp2, m2 = _pad_slab(y1)

    if stride != 1 or cin != cout:
        # Projection shortcut (1x1 conv + BN) fused into the second kernel.
        ssc, bsc = _fold_bn(*params["bnsc"], eps)
        wsc = _fold_w1x1(params["wsc"], ssc)
        x_sc = x[:, ::stride, ::stride, :]                          # (n, ho, wo, cin)
        x_sc = jnp.pad(x_sc, ((0, 0), (0, 0), (0, wp2 - wo), (0, 0)))
        xs_slab = x_sc.reshape(n, m2, cin).astype(jnp.bfloat16)
        out = _conv2_proj_call(y_slab, w2, b2, xs_slab, wsc, bsc, wp=wp2, m=m2)
    else:
        # Identity shortcut, fused as a residual add in the epilogue.
        res = jnp.pad(x, ((0, 0), (0, 0), (0, wp2 - wo), (0, 0)))
        res = res.reshape(n, m2, cout)
        out = _conv2_id_call(y_slab, w2, b2, res, wp=wp2, m=m2)

    out = out.reshape(n, ho, wp2, cout)[:, :, :wo, :]
    return jnp.transpose(out, (0, 3, 1, 2))                         # back to NCHW


def init_params(key, in_channels, out_channels, stride=1):
    ks = jax.random.split(key, 8)

    def bn_params(k, c):
        k1, k2, k3 = jax.random.split(k, 3)
        gamma = 1.0 + 0.1 * jax.random.normal(k1, (c,), jnp.float32)
        beta = 0.1 * jax.random.normal(k2, (c,), jnp.float32)
        mean = 0.1 * jax.random.normal(k3, (c,), jnp.float32)
        var = jnp.ones((c,), jnp.float32) * 0.9
        return (gamma, beta, mean, var)

    params = {
        "w1": 0.1 * jax.random.normal(ks[0], (out_channels, in_channels, 3, 3), jnp.float32),
        "bn1": bn_params(ks[1], out_channels),
        "w2": 0.1 * jax.random.normal(ks[2], (out_channels, out_channels, 3, 3), jnp.float32),
        "bn2": bn_params(ks[3], out_channels),
    }
    if stride != 1 or in_channels != out_channels:
        params["wsc"] = 0.1 * jax.random.normal(
            ks[4], (out_channels, in_channels, 1, 1), jnp.float32)
        params["bnsc"] = bn_params(ks[5], out_channels)
    return params


def _reference_forward(x_nchw, params, stride=1, eps=1e-5):
    """Pure-JAX (XLA) f32 reference for the same BasicBlock semantics."""
    def conv(x, w, s, pad):
        return jax.lax.conv_general_dilated(
            x, w, (s, s), ((pad, pad), (pad, pad)),
            dimension_numbers=("NCHW", "OIHW", "NCHW"))

    def bn(x, p):
        gamma, beta, mean, var = p
        s = gamma / jnp.sqrt(var + eps)
        b = beta - mean * s
        return x * s[None, :, None, None] + b[None, :, None, None]

    y = jax.nn.relu(bn(conv(x_nchw, params["w1"], stride, 1), params["bn1"]))
    y = bn(conv(y, params["w2"], 1, 1), params["bn2"])
    if "wsc" in params:
        sc = bn(conv(x_nchw, params["wsc"], stride, 0), params["bnsc"])
    else:
        sc = x_nchw
    return jax.nn.relu(y + sc)


if __name__ == "__main__":
    key = jax.random.PRNGKey(0)

    configs = [
        # (N, Cin, H, W, Cout, stride)
        (2, 4, 16, 16, 8, 1),   # Cin != Cout -> fused 1x1-conv projection shortcut
        (2, 8, 16, 16, 8, 1),   # identity shortcut path
    ]
    for idx, (n, cin, h, w, cout, stride) in enumerate(configs):
        k_x, k_p = jax.random.split(jax.random.fold_in(key, idx))
        x = jax.random.normal(k_x, (n, cin, h, w), jnp.float32)
        params = init_params(k_p, cin, cout, stride)

        out = jax.block_until_ready(basic_block_forward(x, params, stride=stride))
        ref = jax.block_until_ready(_reference_forward(x, params, stride=stride))

        assert out.shape == (n, cout, h // stride, w // stride), out.shape
        assert bool(jnp.all(out >= 0.0))                      # final ReLU
        err = float(jnp.max(jnp.abs(out - ref)))
        assert err < 1e-1, f"config {idx}: max abs err = {err}"  # bf16 matmul tolerance

    print("KERNEL_OK")
</pallas_src>

<mosaic_0001>
module attributes {stable_mosaic.version = 11 : i64} {
  func.func @_conv_bn_relu_kernel(%arg0: i32, %arg1: memref<1x342x4xf32, #tpu.memory_space<vmem>>, %arg2: memref<9x4x8xbf16, #tpu.memory_space<vmem>>, %arg3: memref<1x8xf32, #tpu.memory_space<vmem>>, %arg4: memref<1x288x8xf32, #tpu.memory_space<vmem>>) attributes {dimension_semantics = [#tpu.dimension_semantics<parallel>], iteration_bounds = array<i64: 2>, scalar_prefetch = 0 : i64, scratch_operands = 0 : i64, tpu.core_type = #tpu.core_type<tc>, window_params = [{transform_indices = @transform_0, window_bounds = array<i64: 1, 342, 4>}, {pipeline_mode = #tpu.pipeline_mode<synchronous>, transform_indices = @transform_1, window_bounds = array<i64: 9, 4, 8>}, {pipeline_mode = #tpu.pipeline_mode<synchronous>, transform_indices = @transform_2, window_bounds = array<i64: 1, 8>}, {transform_indices = @transform_3, window_bounds = array<i64: 1, 288, 8>}]} {
    %c0 = arith.constant 0 : index
    %c0_0 = arith.constant 0 : index
    %c0_1 = arith.constant 0 : index
    %0 = vector.load %arg1[%c0, %c0_0, %c0_1] : memref<1x342x4xf32, #tpu.memory_space<vmem>>, vector<1x288x4xf32>
    %1 = vector.shape_cast %0 : vector<1x288x4xf32> to vector<288x4xf32>
    %2 = arith.truncf %1 : vector<288x4xf32> to vector<288x4xbf16>
    %c0_2 = arith.constant 0 : index
    %c0_3 = arith.constant 0 : index
    %c0_4 = arith.constant 0 : index
    %3 = vector.load %arg2[%c0_2, %c0_3, %c0_4] : memref<9x4x8xbf16, #tpu.memory_space<vmem>>, vector<1x4x8xbf16>
    %4 = vector.shape_cast %3 : vector<1x4x8xbf16> to vector<4x8xbf16>
    %cst = arith.constant dense<0.000000e+00> : vector<288x8xf32>
    %5 = tpu.matmul %2, %4, %cst {dimension_numbers = #tpu.dot_dimension_numbers<[1], [0], [0], [1], [0, 0, 1, 1], [], []>} : vector<288x4xbf16>, vector<4x8xbf16>, vector<288x8xf32> -> vector<288x8xf32>
    %c0_5 = arith.constant 0 : index
    %c1 = arith.constant 1 : index
    %c0_6 = arith.constant 0 : index
    %6 = vector.load %arg1[%c0_5, %c1, %c0_6] : memref<1x342x4xf32, #tpu.memory_space<vmem>>, vector<1x288x4xf32>
    %7 = vector.shape_cast %6 : vector<1x288x4xf32> to vector<288x4xf32>
    %8 = arith.truncf %7 : vector<288x4xf32> to vector<288x4xbf16>
    %c1_7 = arith.constant 1 : index
    %c0_8 = arith.constant 0 : index
    %c0_9 = arith.constant 0 : index
    %9 = vector.load %arg2[%c1_7, %c0_8, %c0_9] : memref<9x4x8xbf16, #tpu.memory_space<vmem>>, vector<1x4x8xbf16>
    %10 = vector.shape_cast %9 : vector<1x4x8xbf16> to vector<4x8xbf16>
    %cst_10 = arith.constant dense<0.000000e+00> : vector<288x8xf32>
    %11 = tpu.matmul %8, %10, %cst_10 {dimension_numbers = #tpu.dot_dimension_numbers<[1], [0], [0], [1], [0, 0, 1, 1], [], []>} : vector<288x4xbf16>, vector<4x8xbf16>, vector<288x8xf32> -> vector<288x8xf32>
    %12 = arith.addf %5, %11 : vector<288x8xf32>
    %c0_11 = arith.constant 0 : index
    %c2 = arith.constant 2 : index
    %c0_12 = arith.constant 0 : index
    %13 = vector.load %arg1[%c0_11, %c2, %c0_12] : memref<1x342x4xf32, #tpu.memory_space<vmem>>, vector<1x288x4xf32>
    %14 = vector.shape_cast %13 : vector<1x288x4xf32> to vector<288x4xf32>
    %15 = arith.truncf %14 : vector<288x4xf32> to vector<288x4xbf16>
    %c2_13 = arith.constant 2 : index
    %c0_14 = arith.constant 0 : index
    %c0_15 = arith.constant 0 : index
    %16 = vector.load %arg2[%c2_13, %c0_14, %c0_15] : memref<9x4x8xbf16, #tpu.memory_space<vmem>>, vector<1x4x8xbf16>
    %17 = vector.shape_cast %16 : vector<1x4x8xbf16> to vector<4x8xbf16>
    %cst_16 = arith.constant dense<0.000000e+00> : vector<288x8xf32>
    %18 = tpu.matmul %15, %17, %cst_16 {dimension_numbers = #tpu.dot_dimension_numbers<[1], [0], [0], [1], [0, 0, 1, 1], [], []>} : vector<288x4xbf16>, vector<4x8xbf16>, vector<288x8xf32> -> vector<288x8xf32>
    %19 = arith.addf %12, %18 : vector<288x8xf32>
    %c0_17 = arith.constant 0 : index
    %c18 = arith.constant 18 : index
    %c0_18 = arith.constant 0 : index
    %20 = vector.load %arg1[%c0_17, %c18, %c0_18] : memref<1x342x4xf32, #tpu.memory_space<vmem>>, vector<1x288x4xf32>
    %21 = vector.shape_cast %20 : vector<1x288x4xf32> to vector<288x4xf32>
    %22 = arith.truncf %21 : vector<288x4xf32> to vector<288x4xbf16>
    %c3 = arith.constant 3 : index
    %c0_19 = arith.constant 0 : index
    %c0_20 = arith.constant 0 : index
    %23 = vector.load %arg2[%c3, %c0_19, %c0_20] : memref<9x4x8xbf16, #tpu.memory_space<vmem>>, vector<1x4x8xbf16>
    %24 = vector.shape_cast %23 : vector<1x4x8xbf16> to vector<4x8xbf16>
    %cst_21 = arith.constant dense<0.000000e+00> : vector<288x8xf32>
    %25 = tpu.matmul %22, %24, %cst_21 {dimension_numbers = #tpu.dot_dimension_numbers<[1], [0], [0], [1], [0, 0, 1, 1], [], []>} : vector<288x4xbf16>, vector<4x8xbf16>, vector<288x8xf32> -> vector<288x8xf32>
    %26 = arith.addf %19, %25 : vector<288x8xf32>
    %c0_22 = arith.constant 0 : index
    %c19 = arith.constant 19 : index
    %c0_23 = arith.constant 0 : index
    %27 = vector.load %arg1[%c0_22, %c19, %c0_23] : memref<1x342x4xf32, #tpu.memory_space<vmem>>, vector<1x288x4xf32>
    %28 = vector.shape_cast %27 : vector<1x288x4xf32> to vector<288x4xf32>
    %29 = arith.truncf %28 : vector<288x4xf32> to vector<288x4xbf16>
    %c4 = arith.constant 4 : index
    %c0_24 = arith.constant 0 : index
    %c0_25 = arith.constant 0 : index
    %30 = vector.load %arg2[%c4, %c0_24, %c0_25] : memref<9x4x8xbf16, #tpu.memory_space<vmem>>, vector<1x4x8xbf16>
    %31 = vector.shape_cast %30 : vector<1x4x8xbf16> to vector<4x8xbf16>
    %cst_26 = arith.constant dense<0.000000e+00> : vector<288x8xf32>
    %32 = tpu.matmul %29, %31, %cst_26 {dimension_numbers = #tpu.dot_dimension_numbers<[1], [0], [0], [1], [0, 0, 1, 1], [], []>} : vector<288x4xbf16>, vector<4x8xbf16>, vector<288x8xf32> -> vector<288x8xf32>
    %33 = arith.addf %26, %32 : vector<288x8xf32>
    %c0_27 = arith.constant 0 : index
    %c20 = arith.constant 20 : index
    %c0_28 = arith.constant 0 : index
    %34 = vector.load %arg1[%c0_27, %c20, %c0_28] : memref<1x342x4xf32, #tpu.memory_space<vmem>>, vector<1x288x4xf32>
    %35 = vector.shape_cast %34 : vector<1x288x4xf32> to vector<288x4xf32>
    %36 = arith.truncf %35 : vector<288x4xf32> to vector<288x4xbf16>
    %c5 = arith.constant 5 : index
    %c0_29 = arith.constant 0 : index
    %c0_30 = arith.constant 0 : index
    %37 = vector.load %arg2[%c5, %c0_29, %c0_30] : memref<9x4x8xbf16, #tpu.memory_space<vmem>>, vector<1x4x8xbf16>
    %38 = vector.shape_cast %37 : vector<1x4x8xbf16> to vector<4x8xbf16>
    %cst_31 = arith.constant dense<0.000000e+00> : vector<288x8xf32>
    %39 = tpu.matmul %36, %38, %cst_31 {dimension_numbers = #tpu.dot_dimension_numbers<[1], [0], [0], [1], [0, 0, 1, 1], [], []>} : vector<288x4xbf16>, vector<4x8xbf16>, vector<288x8xf32> -> vector<288x8xf32>
    %40 = arith.addf %33, %39 : vector<288x8xf32>
    %c0_32 = arith.constant 0 : index
    %c36 = arith.constant 36 : index
    %c0_33 = arith.constant 0 : index
    %41 = vector.load %arg1[%c0_32, %c36, %c0_33] : memref<1x342x4xf32, #tpu.memory_space<vmem>>, vector<1x288x4xf32>
    %42 = vector.shape_cast %41 : vector<1x288x4xf32> to vector<288x4xf32>
    %43 = arith.truncf %42 : vector<288x4xf32> to vector<288x4xbf16>
    %c6 = arith.constant 6 : index
    %c0_34 = arith.constant 0 : index
    %c0_35 = arith.constant 0 : index
    %44 = vector.load %arg2[%c6, %c0_34, %c0_35] : memref<9x4x8xbf16, #tpu.memory_space<vmem>>, vector<1x4x8xbf16>
    %45 = vector.shape_cast %44 : vector<1x4x8xbf16> to vector<4x8xbf16>
    %cst_36 = arith.constant dense<0.000000e+00> : vector<288x8xf32>
    %46 = tpu.matmul %43, %45, %cst_36 {dimension_numbers = #tpu.dot_dimension_numbers<[1], [0], [0], [1], [0, 0, 1, 1], [], []>} : vector<288x4xbf16>, vector<4x8xbf16>, vector<288x8xf32> -> vector<288x8xf32>
    %47 = arith.addf %40, %46 : vector<288x8xf32>
    %c0_37 = arith.constant 0 : index
    %c37 = arith.constant 37 : index
    %c0_38 = arith.constant 0 : index
    %48 = vector.load %arg1[%c0_37, %c37, %c0_38] : memref<1x342x4xf32, #tpu.memory_space<vmem>>, vector<1x288x4xf32>
    %49 = vector.shape_cast %48 : vector<1x288x4xf32> to vector<288x4xf32>
    %50 = arith.truncf %49 : vector<288x4xf32> to vector<288x4xbf16>
    %c7 = arith.constant 7 : index
    %c0_39 = arith.constant 0 : index
    %c0_40 = arith.constant 0 : index
    %51 = vector.load %arg2[%c7, %c0_39, %c0_40] : memref<9x4x8xbf16, #tpu.memory_space<vmem>>, vector<1x4x8xbf16>
    %52 = vector.shape_cast %51 : vector<1x4x8xbf16> to vector<4x8xbf16>
    %cst_41 = arith.constant dense<0.000000e+00> : vector<288x8xf32>
    %53 = tpu.matmul %50, %52, %cst_41 {dimension_numbers = #tpu.dot_dimension_numbers<[1], [0], [0], [1], [0, 0, 1, 1], [], []>} : vector<288x4xbf16>, vector<4x8xbf16>, vector<288x8xf32> -> vector<288x8xf32>
    %54 = arith.addf %47, %53 : vector<288x8xf32>
    %c0_42 = arith.constant 0 : index
    %c38 = arith.constant 38 : index
    %c0_43 = arith.constant 0 : index
    %55 = vector.load %arg1[%c0_42, %c38, %c0_43] : memref<1x342x4xf32, #tpu.memory_space<vmem>>, vector<1x288x4xf32>
    %56 = vector.shape_cast %55 : vector<1x288x4xf32> to vector<288x4xf32>
    %57 = arith.truncf %56 : vector<288x4xf32> to vector<288x4xbf16>
    %c8 = arith.constant 8 : index
    %c0_44 = arith.constant 0 : index
    %c0_45 = arith.constant 0 : index
    %58 = vector.load %arg2[%c8, %c0_44, %c0_45] : memref<9x4x8xbf16, #tpu.memory_space<vmem>>, vector<1x4x8xbf16>
    %59 = vector.shape_cast %58 : vector<1x4x8xbf16> to vector<4x8xbf16>
    %cst_46 = arith.constant dense<0.000000e+00> : vector<288x8xf32>
    %60 = tpu.matmul %57, %59, %cst_46 {dimension_numbers = #tpu.dot_dimension_numbers<[1], [0], [0], [1], [0, 0, 1, 1], [], []>} : vector<288x4xbf16>, vector<4x8xbf16>, vector<288x8xf32> -> vector<288x8xf32>
    %61 = arith.addf %54, %60 : vector<288x8xf32>
    %c0_47 = arith.constant 0 : index
    %c0_48 = arith.constant 0 : index
    %62 = vector.load %arg3[%c0_47, %c0_48] : memref<1x8xf32, #tpu.memory_space<vmem>>, vector<1x8xf32>
    %63 = vector.broadcast %62 : vector<1x8xf32> to vector<288x8xf32>
    %64 = arith.addf %61, %63 : vector<288x8xf32>
    %cst_49 = arith.constant 0.000000e+00 : f32
    %65 = vector.broadcast %cst_49 : f32 to vector<288x8xf32>
    %66 = arith.maximumf %64, %65 : vector<288x8xf32>
    %c0_50 = arith.constant 0 : index
    %c0_51 = arith.constant 0 : index
    %c0_52 = arith.constant 0 : index
    %67 = vector.load %arg4[%c0_50, %c0_51, %c0_52] : memref<1x288x8xf32, #tpu.memory_space<vmem>>, vector<1x288x8xf32>
    %68 = vector.shape_cast %67 : vector<1x288x8xf32> to vector<288x8xf32>
    %69 = vector.shape_cast %66 : vector<288x8xf32> to vector<1x288x8xf32>
    tpu.vector_store %arg4[%c0_50, %c0_51, %c0_52], %69 {strides = array<i32>} : memref<1x288x8xf32, #tpu.memory_space<vmem>>, vector<1x288x8xf32>,
    return
  }
  func.func @transform_0(%arg0: i32) -> (i32, i32, i32) {
    %c0_i32 = arith.constant 0 : i32
    %c0_i32_0 = arith.constant 0 : i32
    %c0_i32_1 = arith.constant 0 : i32
    return %arg0, %c0_i32, %c0_i32_0 : i32, i32, i32
  }
  func.func @transform_1(%arg0: i32) -> (i32, i32, i32) {
    %c0_i32 = arith.constant 0 : i32
    %c0_i32_0 = arith.constant 0 : i32
    %c0_i32_1 = arith.constant 0 : i32
    %c0_i32_2 = arith.constant 0 : i32
    return %c0_i32, %c0_i32_0, %c0_i32_1 : i32, i32, i32
  }
  func.func @transform_2(%arg0: i32) -> (i32, i32) {
    %c0_i32 = arith.constant 0 : i32
    %c0_i32_0 = arith.constant 0 : i32
    %c0_i32_1 = arith.constant 0 : i32
    return %c0_i32, %c0_i32_0 : i32, i32
  }
  func.func @transform_3(%arg0: i32) -> (i32, i32, i32) {
    %c0_i32 = arith.constant 0 : i32
    %c0_i32_0 = arith.constant 0 : i32
    %c0_i32_1 = arith.constant 0 : i32
    return %arg0, %c0_i32, %c0_i32_0 : i32, i32, i32
  }
}

</mosaic_0001>

<bundles_post_ra>
// kernel: tpu_custom_call.1
= control target key start
LH: loop header
LB: loop body
LE: loop exit
PB: predicated region body
PF: predicated region fallthrough
CT: control target
= control target key end

     0   :  { %s4237_s12 = smov 0   ;;  %s5028_s0 = inlined_call_operand.vmem [shape: f32[2,342,4], index: 0, kind: input, shape index: {}]   ;;  %s5029_s1 = inlined_call_operand.vmem [shape: bf16[9,4,8], index: 1, kind: input, shape index: {}]   ;;  %s5030_s2 = inlined_call_operand.vmem [shape: f32[1,8], index: 2, kind: input, shape index: {}]   ;;  %s5031_s3 = inlined_call_operand.vmem [shape: f32[2,288,8], index: 3, kind: output, shape index: {}]  }
   0x1 LB: > { %s3206_s13 = sadd.s32 4294967295, %s4215_s12   ;;  %p3210_p0 = scmp.ge.s32.totalorder %s4215_s12, 1  ;;  %s4215_s12 = sphi %s4237_s12, %s13_s12  }
   0x2   : > { %p137_p1 = scmp.lt.s32.totalorder %s4215_s12, 3 }
   0x4   : > { %p138_p2 = pnand %p3210_p0, %p137_p1 }
   0x5   : > { %vm338_vm0 = vcmask (!%p138_p2), 1041408   ;;  %v4248_v0 = vld [vmem:[%s5029_s1 + $0x8] sm:$0x3] (!%p138_p2)  ;;  %v3213_v1 = vld [vmem:[%s5029_s1 + $0x2] sm:$0x3] (!%p138_p2)  ;;  %p161_p3 = scmp.lt.s32.totalorder (!%p138_p2), %s3206_s13, 1 }
   0x6   : > { %141 = sbr.rel (%p138_p2) target bundleno = 564 (0x234), region = 32  ;;  %4193 = vmatprep.subr.msk.bf16.mxu0 (!%p138_p2), %vm338_vm0, %v4248_v0  ;;  %4189 = vmatprep.subr.msk.bf16.mxu1 (!%p138_p2), %vm338_vm0, %v3213_v1  ;;  %v4258_v2 = vsel (!%p138_p2), %vm338_vm0, %v4248_v0, 0  ;;  %v340_v3 = vsel (!%p138_p2), %vm338_vm0, %v3213_v1, 0  ;;  %v3307_v4 = vld [vmem:[%s5029_s1 + $0xa] sm:$0x3] (!%p138_p2)  ;;  %vm283_vm1 = vcmask (!%p138_p2), 31744  }
   0x7   : > { %3710 = vmatpush3.bf16.msra.mxu0 (!%p138_p2), %v4258_v2  ;;  %3558 = vmatpush3.bf16.msra.mxu1 (!%p138_p2), %v340_v3  ;;  %v226_v5 = vld [vmem:[%s5029_s1] sm:$0x3] (!%p138_p2)  ;;  %v1842_v20 = vsel (!%p138_p2), %vm338_vm0, %v3307_v4, 0  ;;  %v4298_v26 = vld [vmem:[%s5029_s1 + $0xc] sm:$0x3] (!%p138_p2)  ;;  %vm3114_vm2 = vcmask (!%p138_p2), 64512  }
   0x8   : > { %4195 = vmatprep.subr.msk.bf16.mxu0 (!%p138_p2), %vm338_vm0, %v3307_v4  ;;  %4190 = vmatprep.subr.msk.bf16.mxu1 (!%p138_p2), %vm338_vm0, %v226_v5  ;;  %v574_v18 = vsel (!%p138_p2), %vm338_vm0, %v226_v5, 0  ;;  %v4303_v27 = vld [vmem:[%s5029_s1 + $0x4] sm:$0x3] (!%p138_p2) }
   0xd   : > { %s5033_s13 = smov (!%p161_p3, %s3206_s13), 1 }
   0xe   : > { %s4199_s22 = smul.u32 344, %s5033_s13 }
   0xf   : > { %s4200_s9 = smul.u32 288, %s5033_s13 }
  0x10   : > { %s4276_s25 = scalar_lea.vmem %s5028_s0, %s4199_s22 }
  0x11   : > { %v227_v6 = vld [vmem:[%s4276_s25 + $0x1] sm:$0xff]  ;;  %v228_v7 = vld [vmem:[%s4276_s25 + $0x9] sm:$0xff]  ;;  %v1405_v8 = vld [vmem:[%s4276_s25 + $0x13] sm:$0xff]  ;;  %s4908_s16 = scalar_lea.vmem %s5031_s3, %s4200_s9 }
  0x12   : > { %v263_v9 = vpack.c.bf16 %v228_v7, %v227_v6  ;;  %v1406_v10 = vld [vmem:[%s4276_s25 + $0x1b] sm:$0xff]  ;;  %v229_v11 = vld [vmem:[%s4276_s25 + $0x11] sm:$0xff]  ;;  %v1407_v15 = vld [vmem:[%s4276_s25 + $0x23] sm:$0xff] }
  0x13   : > { %v230_v12 = vld [vmem:[%s4276_s25 + $0x19] sm:$0xff]  ;;  %v1441_v13 = vpack.c.bf16 %v1406_v10, %v1405_v8  ;;  %v1408_v16 = vld [vmem:[%s4276_s25 + $0x2b] sm:$0xff]  ;;  %v231_v17 = vld [vmem:[%s4276_s25 + $0x21] sm:$0xff] }
  0x14   : > { %v264_v14 = vpack.c.bf16 %v230_v12, %v229_v11  ;;  %3559 = vmatprep.mubr.msk.bf16.mxu1 %vm283_vm1, %v263_v9  ;;  %v1442_v19 = vpack.c.bf16 %v1408_v16, %v1407_v15  ;;  %v232_v21 = vld [vmem:[%s4276_s25 + $0x29] sm:$0xff]  ;;  %v1409_v22 = vld [vmem:[%s4276_s25 + $0x33] sm:$0xff]  ;;  %v1410_v23 = vld [vmem:[%s4276_s25 + $0x3b] sm:$0xff] }
  0x15   : > { %3711 = vmatprep.mubr.msk.bf16.mxu0 %vm283_vm1, %v1441_v13  ;;  %v265_v24 = vpack.c.bf16 %v232_v21, %v231_v17  ;;  %v1443_v25 = vpack.c.bf16 %v1410_v23, %v1409_v22  ;;  %v233_v28 = vld [vmem:[%s4276_s25 + $0x31] sm:$0xff]  ;;  %v234_v29 = vld [vmem:[%s4276_s25 + $0x39] sm:$0xff]  ;;  %v1411_v30 = vld [vmem:[%s4276_s25 + $0x43] sm:$0xff] }
  0x16   : > { %3560 = vmatmul.mubr.msk.bf16.vlgmr.msra.gmra.mrb[0].mxu1 %vm283_vm1, %v264_v14  ;;  %3712 = vmatmul.mubr.msk.bf16.vlgmr.msra.gmra.mrb[0].mxu0 %vm283_vm1, %v1442_v19  ;;  %v1412_v31 = vld [vmem:[%s4276_s25 + $0x4b] sm:$0xff]  ;;  %v235_v32 = vld [vmem:[%s4276_s25 + $0x41] sm:$0xff]  ;;  %v1413_v34 = vld [vmem:[%s4276_s25 + $0x53] sm:$0xff]  ;;  %v266_v36 = vpack.c.bf16 %v234_v29, %v233_v28  ;;  %v2168_v28 = vsel %vm338_vm0, %v4298_v26, 0 }
  0x17   : > { %3596 = vmatpush3.bf16.msra.mxu1 %v574_v18  ;;  %3748 = vmatpush3.bf16.msra.mxu0 %v1842_v20  ;;  %v236_v33 = vld [vmem:[%s4276_s25 + $0x49] sm:$0xff]  ;;  %v1414_v35 = vld [vmem:[%s4276_s25 + $0x5b] sm:$0xff]  ;;  %v1444_v37 = vpack.c.bf16 %v1412_v31, %v1411_v30  ;;  %v237_v40 = vld [vmem:[%s4276_s25 + $0x51] sm:$0xff] }
  0x18   : > { %3563 = vmatprep.mubr.msk.bf16.mxu1 %vm283_vm1, %v265_v24  ;;  %3715 = vmatprep.mubr.msk.bf16.mxu0 %vm283_vm1, %v1443_v25  ;;  %v267_v38 = vpack.c.bf16 %v236_v33, %v235_v32  ;;  %v1445_v39 = vpack.c.bf16 %v1414_v35, %v1413_v34  ;;  %v238_v41 = vld [vmem:[%s4276_s25 + $0x59] sm:$0xff]  ;;  %v1415_v42 = vld [vmem:[%s4276_s25 + $0x63] sm:$0xff]  ;;  %v1416_v43 = vld [vmem:[%s4276_s25 + $0x6b] sm:$0xff] }
  0x19   : > { %4196 = vmatprep.subr.msk.bf16.mxu0 %vm338_vm0, %v4298_v26  ;;  %4191 = vmatprep.subr.msk.bf16.mxu1 %vm338_vm0, %v4303_v27  ;;  %v239_v44 = vld [vmem:[%s4276_s25 + $0x61] sm:$0xff]  ;;  %v240_v45 = vld [vmem:[%s4276_s25 + $0x69] sm:$0xff]  ;;  %v1417_v46 = vld [vmem:[%s4276_s25 + $0x73] sm:$0xff]  ;;  %v268_v48 = vpack.c.bf16 %v238_v41, %v237_v40  ;;  %v1446_v49 = vpack.c.bf16 %v1416_v43, %v1415_v42 }
  0x1a   : > { %v1418_v47 = vld [vmem:[%s4276_s25 + $0x7b] sm:$0xff]  ;;  %v269_v50 = vpack.c.bf16 %v240_v45, %v239_v44  ;;  %v241_v52 = vld [vmem:[%s4276_s25 + $0x71] sm:$0xff]  ;;  %v1419_v54 = vld [vmem:[%s4276_s25 + $0x83] sm:$0xff] }
  0x1b   : > { %v1447_v51 = vpack.c.bf16 %v1418_v47, %v1417_v46  ;;  %v242_v53 = vld [vmem:[%s4276_s25 + $0x79] sm:$0xff]  ;;  %v1420_v55 = vld [vmem:[%s4276_s25 + $0x8b] sm:$0xff]  ;;  %v243_v56 = vld [vmem:[%s4276_s25 + $0x81] sm:$0xff] }
  0x1c   : > { %v244_v57 = vld [vmem:[%s4276_s25 + $0x89] sm:$0xff]  ;;  %v1421_v58 = vld [vmem:[%s4276_s25 + $0x93] sm:$0xff]  ;;  %v1422_v59 = vld [vmem:[%s4276_s25 + $0x9b] sm:$0xff]  ;;  %v270_v60 = vpack.c.bf16 %v242_v53, %v241_v52  ;;  %v1448_v61 = vpack.c.bf16 %v1420_v55, %v1419_v54 }
  0x1d   : > { %v271_v62 = vpack.c.bf16 %v244_v57, %v243_v56  ;;  %v1449_v63 = vpack.c.bf16 %v1422_v59, %v1421_v58  ;;  %v245_v1 = vld [vmem:[%s4276_s25 + $0x91] sm:$0xff]  ;;  %v246_v3 = vld [vmem:[%s4276_s25 + $0x99] sm:$0xff]  ;;  %v1423_v4 = vld [vmem:[%s4276_s25 + $0xa3] sm:$0xff] }
  0x1e   : > { %3564 = vmatmul.mubr.msk.bf16.gmra.mrb[4].mxu1 %vm283_vm1, %v266_v36  ;;  %3716 = vmatmul.mubr.msk.bf16.gmra.mrb[4].mxu0 %vm283_vm1, %v1444_v37  ;;  %v1424_v5 = vld [vmem:[%s4276_s25 + $0xab] sm:$0xff]  ;;  %v247_v6 = vld [vmem:[%s4276_s25 + $0xa1] sm:$0xff]  ;;  %v1731_v8 = vld [vmem:[%s4276_s25 + $0x14] sm:$0xff]  ;;  %v272_v10 = vpack.c.bf16 %v246_v3, %v245_v1 }
  0x1f   : > { %3567 = vmatprep.mubr.msk.bf16.mxu1 %vm283_vm1, %v267_v38  ;;  %3719 = vmatprep.mubr.msk.bf16.mxu0 %vm283_vm1, %v1445_v39  ;;  %v248_v7 = vld [vmem:[%s4276_s25 + $0xa9] sm:$0xff]  ;;  %v1732_v9 = vld [vmem:[%s4276_s25 + $0x1c] sm:$0xff]  ;;  %v1450_v11 = vpack.c.bf16 %v1424_v5, %v1423_v4  ;;  %v249_v14 = vld [vmem:[%s4276_s25 + $0xb1] sm:$0xff] }
  0x20   : > { %v273_v12 = vpack.c.bf16 %v248_v7, %v247_v6  ;;  %v1767_v13 = vpack.c.bf16 %v1732_v9, %v1731_v8  ;;  %v250_v15 = vld [vmem:[%s4276_s25 + $0xb9] sm:$0xff]  ;;  %v1733_v16 = vld [vmem:[%s4276_s25 + $0x24] sm:$0xff]  ;;  %v1734_v17 = vld [vmem:[%s4276_s25 + $0x2c] sm:$0xff] }
  0x21   : > { %v251_v18 = vld [vmem:[%s4276_s25 + $0xc1] sm:$0xff]  ;;  %v252_v19 = vld [vmem:[%s4276_s25 + $0xc9] sm:$0xff]  ;;  %v1735_v20 = vld [vmem:[%s4276_s25 + $0x34] sm:$0xff]  ;;  %v274_v22 = vpack.c.bf16 %v250_v15, %v249_v14  ;;  %v4368_v23 = vpack.c.bf16 %v1734_v17, %v1733_v16  ;;  %v864_v15 = vsel %vm338_vm0, %v4303_v27, 0 }
  0x22   : > { %v1736_v21 = vld [vmem:[%s4276_s25 + $0x3c] sm:$0xff]  ;;  %v275_v24 = vpack.c.bf16 %v252_v19, %v251_v18  ;;  %v4378_v29 = vld [vmem:[%s5029_s1 + $0xe] sm:$0x3]  ;;  %v253_v30 = vld [vmem:[%s4276_s25 + $0xd1] sm:$0xff] }
  0x23   : > { %v4370_v25 = vpack.c.bf16 %v1736_v21, %v1735_v20  ;;  %v254_v31 = vld [vmem:[%s4276_s25 + $0xd9] sm:$0xff]  ;;  %v1737_v32 = vld [vmem:[%s4276_s25 + $0x44] sm:$0xff]  ;;  %v1738_v26 = vld [vmem:[%s4276_s25 + $0x4c] sm:$0xff] }
  0x24   : > { %v255_v33 = vld [vmem:[%s4276_s25 + $0xe1] sm:$0xff]  ;;  %v256_v34 = vld [vmem:[%s4276_s25 + $0xe9] sm:$0xff]  ;;  %v1739_v35 = vld [vmem:[%s4276_s25 + $0x54] sm:$0xff]  ;;  %v276_v37 = vpack.c.bf16 %v254_v31, %v253_v30  ;;  %v4395_v38 = vpack.c.bf16 %v1738_v26, %v1737_v32 }
  0x25   : > { %v1740_v36 = vld [vmem:[%s4276_s25 + $0x5c] sm:$0xff]  ;;  %v277_v39 = vpack.c.bf16 %v256_v34, %v255_v33  ;;  %v257_v41 = vld [vmem:[%s4276_s25 + $0xf1] sm:$0xff]  ;;  %v1741_v43 = vld [vmem:[%s4276_s25 + $0x64] sm:$0xff] }
  0x26   : > { %3568 = vmatmul.mubr.msk.bf16.gmra.mrb[8].mxu1 %vm283_vm1, %v268_v48  ;;  %3720 = vmatmul.mubr.msk.bf16.gmra.mrb[8].mxu0 %vm283_vm1, %v1446_v49  ;;  %v4397_v40 = vpack.c.bf16 %v1740_v36, %v1739_v35  ;;  %v258_v42 = vld [vmem:[%s4276_s25 + $0xf9] sm:$0xff]  ;;  %v1742_v44 = vld [vmem:[%s4276_s25 + $0x6c] sm:$0xff]  ;;  %v259_v45 = vld [vmem:[%s4276_s25 + $0x101] sm:$0xff] }
  0x27   : > { %3571 = vmatprep.mubr.msk.bf16.mxu1 %vm283_vm1, %v269_v50  ;;  %3723 = vmatprep.mubr.msk.bf16.mxu0 %vm283_vm1, %v1447_v51  ;;  %v260_v46 = vld [vmem:[%s4276_s25 + $0x109] sm:$0xff]  ;;  %v1743_v47 = vld [vmem:[%s4276_s25 + $0x74] sm:$0xff]  ;;  %v1744_v48 = vld [vmem:[%s4276_s25 + $0x7c] sm:$0xff]  ;;  %v278_v49 = vpack.c.bf16 %v258_v42, %v257_v41  ;;  %v4413_v50 = vpack.c.bf16 %v1742_v44, %v1741_v43 }
  0x28   : > { %v279_v51 = vpack.c.bf16 %v260_v46, %v259_v45  ;;  %v4415_v52 = vpack.c.bf16 %v1744_v48, %v1743_v47  ;;  %v261_v53 = vld [vmem:[%s4276_s25 + $0x111] sm:$0xff]  ;;  %v262_v54 = vld [vmem:[%s4276_s25 + $0x119] sm:$0xff]  ;;  %v1745_v55 = vld [vmem:[%s4276_s25 + $0x84] sm:$0xff] }
  0x29   : > { %v1746_v56 = vld [vmem:[%s4276_s25 + $0x8c] sm:$0xff]  ;;  %v172_v57 = vld [vmem:[%s4276_s25] sm:$0xff]  ;;  %v1747_v59 = vld [vmem:[%s4276_s25 + $0x94] sm:$0xff] }
  0x2a   : > { %v173_v58 = vld [vmem:[%s4276_s25 + $0x8] sm:$0xff]  ;;  %v174_v3 = vld [vmem:[%s4276_s25 + $0x10] sm:$0xff]  ;;  %v175_v4 = vld [vmem:[%s4276_s25 + $0x18] sm:$0xff] }
  0x2b   : > { %v1749_v5 = vld [vmem:[%s4276_s25 + $0xa4] sm:$0xff]  ;;  %v1750_v6 = vld [vmem:[%s4276_s25 + $0xac] sm:$0xff]  ;;  %v1751_v9 = vld [vmem:[%s4276_s25 + $0xb4] sm:$0xff] }
  0x2c   : > { %v176_v7 = vld [vmem:[%s4276_s25 + $0x20] sm:$0xff]  ;;  %v177_v8 = vld [vmem:[%s4276_s25 + $0x28] sm:$0xff]  ;;  %v178_v17 = vld [vmem:[%s4276_s25 + $0x30] sm:$0xff] }
  0x2d   : > { %v4459_v16 = vld [vmem:[%s5029_s1 + $0x6] sm:$0x3]  ;;  %v179_v18 = vld [vmem:[%s4276_s25 + $0x38] sm:$0xff]  ;;  %v1754_v27 = vld [vmem:[%s4276_s25 + $0xcc] sm:$0xff] }
  0x2e   : > { %3572 = vmatmul.mubr.msk.bf16.gmra.mrb[12].mxu1 %vm283_vm1, %v270_v60  ;;  %3724 = vmatmul.mubr.msk.bf16.gmra.mrb[12].mxu0 %vm283_vm1, %v1448_v61  ;;  %v1748_v60 = vld [vmem:[%s4276_s25 + $0x9c] sm:$0xff]  ;;  %v280_v61 = vpack.c.bf16 %v262_v54, %v261_v53  ;;  %v1753_v19 = vld [vmem:[%s4276_s25 + $0xc4] sm:$0xff]  ;;  %v182_v26 = vld [vmem:[%s4276_s25 + $0x50] sm:$0xff] }
  0x2f   : > { %3575 = vmatprep.mubr.msk.bf16.mxu1 %vm283_vm1, %v271_v62  ;;  %3727 = vmatprep.mubr.msk.bf16.mxu0 %vm283_vm1, %v1449_v63  ;;  %v4431_v62 = vpack.c.bf16 %v1746_v56, %v1745_v55  ;;  %v208_v63 = vpack.c.bf16 %v173_v58, %v172_v57  ;;  %v4433_v1 = vpack.c.bf16 %v1748_v60, %v1747_v59  ;;  %v180_v20 = vld [vmem:[%s4276_s25 + $0x40] sm:$0xff]  ;;  %v181_v21 = vld [vmem:[%s4276_s25 + $0x48] sm:$0xff]  ;;  %v183_v33 = vld [vmem:[%s4276_s25 + $0x58] sm:$0xff] }
  0x30   : > { %v4476_v30 = vpack.c.bf16 %v1754_v27, %v1753_v19  ;;  %v212_v31 = vpack.c.bf16 %v181_v21, %v180_v20  ;;  %v1757_v34 = vld [vmem:[%s4276_s25 + $0xe4] sm:$0xff]  ;;  %v1758_v35 = vld [vmem:[%s4276_s25 + $0xec] sm:$0xff]  ;;  %v1760_v41 = vld [vmem:[%s4276_s25 + $0xfc] sm:$0xff]  ;;  %v213_v42 = vpack.c.bf16 %v183_v33, %v182_v26 }
  0x31   : > { %v184_v36 = vld [vmem:[%s4276_s25 + $0x60] sm:$0xff]  ;;  %v4494_v43 = vpack.c.bf16 %v1758_v35, %v1757_v34  ;;  %v186_v46 = vld [vmem:[%s4276_s25 + $0x70] sm:$0xff]  ;;  %v187_v47 = vld [vmem:[%s4276_s25 + $0x78] sm:$0xff] }
  0x32   : > { %v1761_v48 = vld [vmem:[%s4276_s25 + $0x104] sm:$0xff]  ;;  %v1763_v54 = vld [vmem:[%s4276_s25 + $0x114] sm:$0xff]  ;;  %v1764_v55 = vld [vmem:[%s4276_s25 + $0x11c] sm:$0xff]  ;;  %v215_v56 = vpack.c.bf16 %v187_v47, %v186_v46 }
  0x33   : > { %v189_v53 = vld [vmem:[%s4276_s25 + $0x88] sm:$0xff]  ;;  %v4514_v59 = vpack.c.bf16 %v1764_v55, %v1763_v54  ;;  %v190_v60 = vld [vmem:[%s4276_s25 + $0x90] sm:$0xff]  ;;  %v199_v27 = vld [vmem:[%s4276_s25 + $0xd8] sm:$0xff] }
  0x34   : > { %v4546_v19 = vld [vmem:[%s5029_s1 + $0x10] sm:$0x3]  ;;  %v201_v20 = vld [vmem:[%s4276_s25 + $0xe8] sm:$0xff]  ;;  %v207_v33 = vld [vmem:[%s4276_s25 + $0x118] sm:$0xff] }
  0x35   : > { %v754_v34 = vld [vmem:[%s4276_s25 + $0xa] sm:$0xff]  ;;  %v769_v54 = vld [vmem:[%s4276_s25 + $0x82] sm:$0xff] }
  0x36   : > { %3576 = vmatmul.mubr.msk.bf16.gmra.mrb[16].mxu1 %vm283_vm1, %v272_v10  ;;  %3728 = vmatmul.mubr.msk.bf16.gmra.mrb[16].mxu0 %vm283_vm1, %v1450_v11  ;;  %v1752_v10 = vld [vmem:[%s4276_s25 + $0xbc] sm:$0xff]  ;;  %v209_v11 = vpack.c.bf16 %v175_v4, %v174_v3  ;;  %v1766_v3 = vld [vmem:[%s4276_s25 + $0x12c] sm:$0xff] }
  0x37   : > { %3579 = vmatprep.mubr.msk.bf16.mxu1 %vm283_vm1, %v273_v12  ;;  %3749 = vmatprep.mubr.msk.bf16.mxu0 %vm283_vm1, %v1767_v13  ;;  %v4449_v12 = vpack.c.bf16 %v1750_v6, %v1749_v5  ;;  %v210_v13 = vpack.c.bf16 %v177_v8, %v176_v7  ;;  %v4451_v14 = vpack.c.bf16 %v1752_v10, %v1751_v9  ;;  %v192_v4 = vld [vmem:[%s4276_s25 + $0xa0] sm:$0xff]  ;;  %v193_v5 = vld [vmem:[%s4276_s25 + $0xa8] sm:$0xff]  ;;  %v194_v9 = vld [vmem:[%s4276_s25 + $0xb0] sm:$0xff] }
  0x38   : > { %v218_v8 = vpack.c.bf16 %v193_v5, %v192_v4  ;;  %v195_v10 = vld [vmem:[%s4276_s25 + $0xb8] sm:$0xff]  ;;  %v762_v46 = vld [vmem:[%s4276_s25 + $0x4a] sm:$0xff] }
  0x39   : > { %v770_v55 = vld [vmem:[%s4276_s25 + $0x8a] sm:$0xff] }
  0x3a   : > { %v2383_v4 = vld [vmem:[%s4276_s25 + $0x25] sm:$0xff] }
  0x3e   : > { %3580 = vmatmul.mubr.msk.bf16.gmra.mrb[20].mxu1 %vm283_vm1, %v274_v22  ;;  %3750 = vmatmul.mubr.msk.bf16.vlgmr.msra.gmra.mrb[0].mxu0 %vm283_vm1, %v4368_v23  ;;  %v1755_v22 = vld [vmem:[%s4276_s25 + $0xd4] sm:$0xff] }
  0x3f   : > { %3583 = vmatprep.mubr.msk.bf16.mxu1 %vm283_vm1, %v275_v24  ;;  %3786 = vmatpush3.bf16.msra.mxu0 %v2168_v28  ;;  %v1756_v24 = vld [vmem:[%s4276_s25 + $0xdc] sm:$0xff]  ;;  %v211_v28 = vpack.c.bf16 %v179_v18, %v178_v17  ;;  %v2494_v18 = vsel %vm338_vm0, %v4378_v29, 0 }
  0x40   : > { %3753 = vmatprep.mubr.msk.bf16.mxu0 %vm283_vm1, %v4370_v25  ;;  %4197 = vmatprep.subr.msk.bf16.mxu0 %vm338_vm0, %v4378_v29  ;;  %v4478_v32 = vpack.c.bf16 %v1756_v24, %v1755_v22  ;;  %v200_v29 = vld [vmem:[%s4276_s25 + $0xe0] sm:$0xff] }
  0x41   : > { %v222_v22 = vpack.c.bf16 %v201_v20, %v200_v29  ;;  %v204_v24 = vld [vmem:[%s4276_s25 + $0x100] sm:$0xff] }
  0x46   : > { %3584 = vmatmul.mubr.msk.bf16.gmra.mrb[24].mxu1 %vm283_vm1, %v276_v37  ;;  %3754 = vmatmul.mubr.msk.bf16.gmra.mrb[4].mxu0 %vm283_vm1, %v4395_v38  ;;  %v185_v37 = vld [vmem:[%s4276_s25 + $0x68] sm:$0xff] }
  0x47   : > { %3587 = vmatprep.mubr.msk.bf16.mxu1 %vm283_vm1, %v277_v39  ;;  %3757 = vmatprep.mubr.msk.bf16.mxu0 %vm283_vm1, %v4397_v40  ;;  %v1759_v39 = vld [vmem:[%s4276_s25 + $0xf4] sm:$0xff]  ;;  %v214_v44 = vpack.c.bf16 %v185_v37, %v184_v36 }
  0x48   : > { %v4496_v45 = vpack.c.bf16 %v1760_v41, %v1759_v39  ;;  %v756_v37 = vld [vmem:[%s4276_s25 + $0x1a] sm:$0xff]  ;;  %v758_v39 = vld [vmem:[%s4276_s25 + $0x2a] sm:$0xff] }
  0x4e   : > { %3588 = vmatmul.mubr.msk.bf16.gmra.mrb[28].mxu1 %vm283_vm1, %v278_v49  ;;  %3758 = vmatmul.mubr.msk.bf16.gmra.mrb[8].mxu0 %vm283_vm1, %v4413_v50  ;;  %v1762_v49 = vld [vmem:[%s4276_s25 + $0x10c] sm:$0xff] }
  0x4f   : > { %3591 = vmatprep.mubr.msk.bf16.mxu1 %vm283_vm1, %v279_v51  ;;  %3761 = vmatprep.mubr.msk.bf16.mxu0 %vm283_vm1, %v4415_v52  ;;  %v188_v51 = vld [vmem:[%s4276_s25 + $0x80] sm:$0xff]  ;;  %v4512_v57 = vpack.c.bf16 %v1762_v49, %v1761_v48  ;;  %v766_v49 = vld [vmem:[%s4276_s25 + $0x6a] sm:$0xff] }
  0x50   : > { %v216_v58 = vpack.c.bf16 %v189_v53, %v188_v51  ;;  %v764_v48 = vld [vmem:[%s4276_s25 + $0x5a] sm:$0xff] }
  0x56   : > { %3592 = vmatmul.mubr.msk.bf16.gmra.mrb[32].mxu1 %vm283_vm1, %v280_v61  ;;  %3762 = vmatmul.mubr.msk.bf16.gmra.mrb[12].mxu0 %vm283_vm1, %v4431_v62  ;;  %v191_v61 = vld [vmem:[%s4276_s25 + $0x98] sm:$0xff] }
  0x57   : > { %3597 = vmatprep.mubr.msk.bf16.mxu1 %vm283_vm1, %v208_v63  ;;  %3765 = vmatprep.mubr.msk.bf16.mxu0 %vm283_vm1, %v4433_v1  ;;  %v1765_v63 = vld [vmem:[%s4276_s25 + $0x124] sm:$0xff]  ;;  %v217_v6 = vpack.c.bf16 %v191_v61, %v190_v60  ;;  %v772_v60 = vld [vmem:[%s4276_s25 + $0x9a] sm:$0xff] }
  0x58   : > { %v4528_v7 = vpack.c.bf16 %v1766_v3, %v1765_v63  ;;  %v2092_v61 = vld [vmem:[%s4276_s25 + $0x13c] sm:$0xff]  ;;  %v774_v3 = vld [vmem:[%s4276_s25 + $0xaa] sm:$0xff] }
  0x59   : > { %v773_v63 = vld [vmem:[%s4276_s25 + $0xa2] sm:$0xff] }
  0x5e   : > { %3598 = vmatmul.mubr.msk.bf16.vlgmr.msra.gmra.mrb[0].mxu1 %vm283_vm1, %v209_v11  ;;  %3766 = vmatmul.mubr.msk.bf16.gmra.mrb[16].mxu0 %vm283_vm1, %v4449_v12  ;;  %v196_v11 = vld [vmem:[%s4276_s25 + $0xc0] sm:$0xff] }
  0x5f   : > { %3601 = vmatprep.mubr.msk.bf16.mxu1 %vm283_vm1, %v210_v13  ;;  %3769 = vmatprep.mubr.msk.bf16.mxu0 %vm283_vm1, %v4451_v14  ;;  %v197_v13 = vld [vmem:[%s4276_s25 + $0xc8] sm:$0xff] }
  0x60   : > { %3634 = vmatpush3.bf16.msra.mxu1 %v864_v15  ;;  %v219_v15 = vpack.c.bf16 %v195_v10, %v194_v9  ;;  %v220_v17 = vpack.c.bf16 %v197_v13, %v196_v11  ;;  %v776_v10 = vld [vmem:[%s4276_s25 + $0xba] sm:$0xff] }
  0x61   : > { %4192 = vmatprep.subr.msk.bf16.mxu1 %vm338_vm0, %v4459_v16  ;;  %v2385_v11 = vld [vmem:[%s4276_s25 + $0x35] sm:$0xff]  ;;  %v2386_v13 = vld [vmem:[%s4276_s25 + $0x3d] sm:$0xff] }
  0x62   : > { %v2420_v29 = vpack.c.bf16 %v2386_v13, %v2385_v11 }
  0x66   : > { %3602 = vmatmul.mubr.msk.bf16.gmra.mrb[4].mxu1 %vm283_vm1, %v211_v28  ;;  %3770 = vmatmul.mubr.msk.bf16.gmra.mrb[20].mxu0 %vm283_vm1, %v4476_v30  ;;  %v205_v28 = vld [vmem:[%s4276_s25 + $0x108] sm:$0xff] }
  0x67   : > { %3605 = vmatprep.mubr.msk.bf16.mxu1 %vm283_vm1, %v212_v31  ;;  %3773 = vmatprep.mubr.msk.bf16.mxu0 %vm283_vm1, %v4478_v32  ;;  %v224_v26 = vpack.c.bf16 %v205_v28, %v204_v24  ;;  %v2389_v24 = vld [vmem:[%s4276_s25 + $0x55] sm:$0xff]  ;;  %v2390_v28 = vld [vmem:[%s4276_s25 + $0x5d] sm:$0xff] }
  0x6e   : > { %3606 = vmatmul.mubr.msk.bf16.gmra.mrb[8].mxu1 %vm283_vm1, %v213_v42  ;;  %3774 = vmatmul.mubr.msk.bf16.gmra.mrb[24].mxu0 %vm283_vm1, %v4494_v43 }
  0x6f   : > { %3609 = vmatprep.mubr.msk.bf16.mxu1 %vm283_vm1, %v214_v44  ;;  %3777 = vmatprep.mubr.msk.bf16.mxu0 %vm283_vm1, %v4496_v45  ;;  %v1190_v44 = vsel %vm338_vm0, %v4459_v16, 0  ;;  %v761_v16 = vld [vmem:[%s4276_s25 + $0x42] sm:$0xff] }
  0x76   : > { %3610 = vmatmul.mubr.msk.bf16.gmra.mrb[12].mxu1 %vm283_vm1, %v215_v56  ;;  %3778 = vmatmul.mubr.msk.bf16.gmra.mrb[28].mxu0 %vm283_vm1, %v4512_v57 }
  0x77   : > { %3613 = vmatprep.mubr.msk.bf16.mxu1 %vm283_vm1, %v216_v58  ;;  %3781 = vmatprep.mubr.msk.bf16.mxu0 %vm283_vm1, %v4514_v59  ;;  %v4643_v58 = vpack.c.bf16 %v770_v55, %v769_v54  ;;  %v2399_v54 = vld [vmem:[%s4276_s25 + $0xa5] sm:$0xff]  ;;  %v2400_v55 = vld [vmem:[%s4276_s25 + $0xad] sm:$0xff] }
  0x7e   : > { %3614 = vmatmul.mubr.msk.bf16.gmra.mrb[16].mxu1 %vm283_vm1, %v217_v6  ;;  %3782 = vmatmul.mubr.msk.bf16.gmra.mrb[32].mxu0 %vm283_vm1, %v4528_v7 }
  0x7f   : > { %3617 = vmatprep.mubr.msk.bf16.mxu1 %vm283_vm1, %v218_v8  ;;  %3787 = vmatprep.mubr.msk.bf16.mxu0 %vm283_vm1, %v4368_v23  ;;  %v198_v23 = vld [vmem:[%s4276_s25 + $0xd0] sm:$0xff]  ;;  %v4663_v8 = vpack.c.bf16 %v774_v3, %v773_v63  ;;  %v2402_v63 = vld [vmem:[%s4276_s25 + $0xbd] sm:$0xff]  ;;  %v2403_v3 = vld [vmem:[%s4276_s25 + $0xc5] sm:$0xff] }
  0x80   : > { %v221_v21 = vpack.c.bf16 %v199_v27, %v198_v23  ;;  %v2388_v23 = vld [vmem:[%s4276_s25 + $0x4d] sm:$0xff] }
  0x86   : > { %3618 = vmatmul.mubr.msk.bf16.gmra.mrb[20].mxu1 %vm283_vm1, %v219_v15  ;;  %3788 = vmatmul.mubr.msk.bf16.vlgmr.msra.gmra.mrb[0].mxu0 %vm283_vm1, %v4370_v25  ;;  %v202_v25 = vld [vmem:[%s4276_s25 + $0xf0] sm:$0xff]  ;;  %v777_v15 = vld [vmem:[%s4276_s25 + $0xc2] sm:$0xff] }
  0x87   : > { %3621 = vmatprep.mubr.msk.bf16.mxu1 %vm283_vm1, %v220_v17  ;;  %3824 = vmatpush3.bf16.msra.mxu0 %v2494_v18  ;;  %v778_v17 = vld [vmem:[%s4276_s25 + $0xca] sm:$0xff] }
  0x88   : > { %3791 = vmatprep.mubr.msk.bf16.mxu0 %vm283_vm1, %v4395_v38  ;;  %4198 = vmatprep.subr.msk.bf16.mxu0 %vm338_vm0, %v4546_v19  ;;  %v203_v38 = vld [vmem:[%s4276_s25 + $0xf8] sm:$0xff]  ;;  %v2387_v18 = vld [vmem:[%s4276_s25 + $0x45] sm:$0xff]  ;;  %v4681_v20 = vpack.c.bf16 %v778_v17, %v777_v15  ;;  %v2412_v15 = vld [vmem:[%s4276_s25 + $0x10d] sm:$0xff] }
  0x89   : > { %v223_v31 = vpack.c.bf16 %v203_v38, %v202_v25  ;;  %v779_v25 = vld [vmem:[%s4276_s25 + $0xd2] sm:$0xff]  ;;  %v780_v38 = vld [vmem:[%s4276_s25 + $0xda] sm:$0xff] }
  0x8e   : > { %3622 = vmatmul.mubr.msk.bf16.gmra.mrb[24].mxu1 %vm283_vm1, %v221_v21  ;;  %3792 = vmatmul.mubr.msk.bf16.gmra.mrb[4].mxu0 %vm283_vm1, %v4397_v40  ;;  %v206_v40 = vld [vmem:[%s4276_s25 + $0x110] sm:$0xff]  ;;  %v2421_v21 = vpack.c.bf16 %v2388_v23, %v2387_v18  ;;  %v2415_v23 = vld [vmem:[%s4276_s25 + $0x125] sm:$0xff] }
  0x8f   : > { %3625 = vmatprep.mubr.msk.bf16.mxu1 %vm283_vm1, %v222_v22  ;;  %3795 = vmatprep.mubr.msk.bf16.mxu0 %vm283_vm1, %v4413_v50  ;;  %v753_v50 = vld [vmem:[%s4276_s25 + $0x2] sm:$0xff]  ;;  %v225_v35 = vpack.c.bf16 %v207_v33, %v206_v40  ;;  %v2820_v22 = vsel %vm338_vm0, %v4546_v19, 0  ;;  %v2392_v40 = vld [vmem:[%s4276_s25 + $0x6d] sm:$0xff]  ;;  %v4699_v33 = vpack.c.bf16 %v780_v38, %v779_v25 }
  0x90   : > { %v789_v36 = vpack.c.bf16 %v754_v34, %v753_v50  ;;  %v781_v19 = vld [vmem:[%s4276_s25 + $0xe2] sm:$0xff]  ;;  %v2422_v50 = vpack.c.bf16 %v2390_v28, %v2389_v24  ;;  %v2710_v38 = vld [vmem:[%s4276_s25 + $0x2e] sm:$0xff] }
  0x91   : > { %v2709_v25 = vld [vmem:[%s4276_s25 + $0x26] sm:$0xff] }
  0x92   : > { %v2745_v28 = vpack.c.bf16 %v2710_v38, %v2709_v25  ;;  %v2737_v25 = vld [vmem:[%s4276_s25 + $0x106] sm:$0xff]  ;;  %v2738_v38 = vld [vmem:[%s4276_s25 + $0x10e] sm:$0xff] }
  0x96   : > { %3626 = vmatmul.mubr.msk.bf16.gmra.mrb[28].mxu1 %vm283_vm1, %v223_v31  ;;  %3796 = vmatmul.mubr.msk.bf16.gmra.mrb[8].mxu0 %vm283_vm1, %v4415_v52  ;;  %v755_v52 = vld [vmem:[%s4276_s25 + $0x12] sm:$0xff]  ;;  %v782_v31 = vld [vmem:[%s4276_s25 + $0xea] sm:$0xff] }
  0x97   : > { %3629 = vmatprep.mubr.msk.bf16.mxu1 %vm283_vm1, %v224_v26  ;;  %3799 = vmatprep.mubr.msk.bf16.mxu0 %vm283_vm1, %v4431_v62  ;;  %v757_v62 = vld [vmem:[%s4276_s25 + $0x22] sm:$0xff]  ;;  %v4589_v41 = vpack.c.bf16 %v756_v37, %v755_v52  ;;  %v4701_v34 = vpack.c.bf16 %v782_v31, %v781_v19  ;;  %v784_v52 = vld [vmem:[%s4276_s25 + $0xfa] sm:$0xff]  ;;  %v2714_v31 = vld [vmem:[%s4276_s25 + $0x4e] sm:$0xff] }
  0x98   : > { %v4591_v42 = vpack.c.bf16 %v758_v39, %v757_v62  ;;  %v2391_v26 = vld [vmem:[%s4276_s25 + $0x65] sm:$0xff]  ;;  %v2393_v37 = vld [vmem:[%s4276_s25 + $0x75] sm:$0xff]  ;;  %v2394_v62 = vld [vmem:[%s4276_s25 + $0x7d] sm:$0xff] }
  0x99   : > { %v785_v39 = vld [vmem:[%s4276_s25 + $0x102] sm:$0xff] }
  0x9a   : > { %v2713_v19 = vld [vmem:[%s4276_s25 + $0x46] sm:$0xff] }
  0x9e   : > { %3630 = vmatmul.mubr.msk.bf16.gmra.mrb[32].mxu1 %vm283_vm1, %v225_v35  ;;  %3800 = vmatmul.mubr.msk.bf16.gmra.mrb[12].mxu0 %vm283_vm1, %v4433_v1  ;;  %v759_v1 = vld [vmem:[%s4276_s25 + $0x32] sm:$0xff]  ;;  %v2423_v35 = vpack.c.bf16 %v2392_v40, %v2391_v26  ;;  %v2747_v40 = vpack.c.bf16 %v2714_v31, %v2713_v19  ;;  %v1439_v19 = vld [vmem:[%s4276_s25 + $0x123] sm:$0xff] }
  0x9f   : > { %3635 = vmatprep.mubr.msk.bf16.mxu1 %vm283_vm1, %v789_v36  ;;  %3803 = vmatprep.mubr.msk.bf16.mxu0 %vm283_vm1, %v4449_v12  ;;  %v760_v12 = vld [vmem:[%s4276_s25 + $0x3a] sm:$0xff]  ;;  %v783_v36 = vld [vmem:[%s4276_s25 + $0xf2] sm:$0xff] }
  0xa0   : > { %v4609_v47 = vpack.c.bf16 %v760_v12, %v759_v1  ;;  %v2395_v1 = vld [vmem:[%s4276_s25 + $0x85] sm:$0xff]  ;;  %v2396_v12 = vld [vmem:[%s4276_s25 + $0x8d] sm:$0xff] }
  0xa1   : > { %v1440_v31 = vld [vmem:[%s4276_s25 + $0x12b] sm:$0xff] }
  0xa6   : > { %3636 = vmatmul.mubr.msk.bf16.vlgmr.msra.gmra.mrb[0].mxu1 %vm283_vm1, %v4589_v41  ;;  %3804 = vmatmul.mubr.msk.bf16.gmra.mrb[16].mxu0 %vm283_vm1, %v4451_v14  ;;  %v4611_v14 = vpack.c.bf16 %v762_v46, %v761_v16  ;;  %v4717_v16 = vpack.c.bf16 %v784_v52, %v783_v36  ;;  %v2424_v46 = vpack.c.bf16 %v2394_v62, %v2393_v37  ;;  %v2721_v37 = vld [vmem:[%s4276_s25 + $0x86] sm:$0xff]  ;;  %v2722_v62 = vld [vmem:[%s4276_s25 + $0x8e] sm:$0xff] }
  0xa7   : > { %3639 = vmatprep.mubr.msk.bf16.mxu1 %vm283_vm1, %v4591_v42  ;;  %3807 = vmatprep.mubr.msk.bf16.mxu0 %vm283_vm1, %v4476_v30  ;;  %v763_v30 = vld [vmem:[%s4276_s25 + $0x52] sm:$0xff] }
  0xa8   : > { %3672 = vmatpush3.bf16.msra.mxu1 %v1190_v44  ;;  %v4625_v51 = vpack.c.bf16 %v764_v48, %v763_v30  ;;  %v786_v44 = vld [vmem:[%s4276_s25 + $0x10a] sm:$0xff]  ;;  %v2425_v48 = vpack.c.bf16 %v2396_v12, %v2395_v1  ;;  %v2723_v12 = vld [vmem:[%s4276_s25 + $0x96] sm:$0xff] }
  0xa9   : > { %4194 = vmatprep.subr.msk.bf16.mxu1 %vm338_vm0, %v4248_v0  ;;  %v765_v0 = vld [vmem:[%s4276_s25 + $0x62] sm:$0xff]  ;;  %v4719_v30 = vpack.c.bf16 %v786_v44, %v785_v39  ;;  %v2751_v44 = vpack.c.bf16 %v2722_v62, %v2721_v37  ;;  %v1114_v1 = vld [vmem:[%s4276_s25 + $0x12a] sm:$0xff] }
  0xaa   : > { %v4627_v53 = vpack.c.bf16 %v766_v49, %v765_v0  ;;  %v787_v0 = vld [vmem:[%s4276_s25 + $0x112] sm:$0xff]  ;;  %v788_v49 = vld [vmem:[%s4276_s25 + $0x11a] sm:$0xff] }
  0xae   : > { %3640 = vmatmul.mubr.msk.bf16.gmra.mrb[4].mxu1 %vm283_vm1, %v4609_v47  ;;  %3808 = vmatmul.mubr.msk.bf16.gmra.mrb[20].mxu0 %vm283_vm1, %v4478_v32  ;;  %v767_v32 = vld [vmem:[%s4276_s25 + $0x72] sm:$0xff] }
  0xaf   : > { %3643 = vmatprep.mubr.msk.bf16.mxu1 %vm283_vm1, %v4611_v14  ;;  %3811 = vmatprep.mubr.msk.bf16.mxu0 %vm283_vm1, %v4494_v43  ;;  %v768_v43 = vld [vmem:[%s4276_s25 + $0x7a] sm:$0xff] }
  0xb0   : > { %v4641_v56 = vpack.c.bf16 %v768_v43, %v767_v32  ;;  %v2397_v32 = vld [vmem:[%s4276_s25 + $0x95] sm:$0xff]  ;;  %v2398_v43 = vld [vmem:[%s4276_s25 + $0x9d] sm:$0xff] }
  0xb6   : > { %3644 = vmatmul.mubr.msk.bf16.gmra.mrb[8].mxu1 %vm283_vm1, %v4625_v51  ;;  %3812 = vmatmul.mubr.msk.bf16.gmra.mrb[24].mxu0 %vm283_vm1, %v4496_v45  ;;  %v771_v45 = vld [vmem:[%s4276_s25 + $0x92] sm:$0xff] }
  0xb7   : > { %3647 = vmatprep.mubr.msk.bf16.mxu1 %vm283_vm1, %v4627_v53  ;;  %3815 = vmatprep.mubr.msk.bf16.mxu0 %vm283_vm1, %v4512_v57  ;;  %v2091_v57 = vld [vmem:[%s4276_s25 + $0x134] sm:$0xff]  ;;  %v4661_v5 = vpack.c.bf16 %v772_v60, %v771_v45  ;;  %v4733_v45 = vpack.c.bf16 %v788_v49, %v787_v0  ;;  %v2426_v60 = vpack.c.bf16 %v2398_v43, %v2397_v32 }
  0xb8   : > { %v2110_v6 = vpack.c.bf16 %v2092_v61, %v2091_v57  ;;  %v2427_v57 = vpack.c.bf16 %v2400_v55, %v2399_v54  ;;  %v2401_v61 = vld [vmem:[%s4276_s25 + $0xb5] sm:$0xff]  ;;  %v1427_v55 = vld [vmem:[%s4276_s25 + $0xc3] sm:$0xff] }
  0xb9   : > { %v2726_v0 = vld [vmem:[%s4276_s25 + $0xae] sm:$0xff] }
  0xbe   : > { %3648 = vmatmul.mubr.msk.bf16.gmra.mrb[12].mxu1 %vm283_vm1, %v4641_v56  ;;  %3816 = vmatmul.mubr.msk.bf16.gmra.mrb[28].mxu0 %vm283_vm1, %v4514_v59  ;;  %v2384_v59 = vld [vmem:[%s4276_s25 + $0x2d] sm:$0xff] }
  0xbf   : > { %3651 = vmatprep.mubr.msk.bf16.mxu1 %vm283_vm1, %v4643_v58  ;;  %3819 = vmatprep.mubr.msk.bf16.mxu0 %vm283_vm1, %v4528_v7  ;;  %v2419_v9 = vpack.c.bf16 %v2384_v59, %v2383_v4  ;;  %v775_v7 = vld [vmem:[%s4276_s25 + $0xb2] sm:$0xff]  ;;  %v2428_v59 = vpack.c.bf16 %v2402_v63, %v2401_v61  ;;  %v1430_v63 = vld [vmem:[%s4276_s25 + $0xdb] sm:$0xff] }
  0xc0   : > { %v4679_v27 = vpack.c.bf16 %v776_v10, %v775_v7  ;;  %v2404_v4 = vld [vmem:[%s4276_s25 + $0xcd] sm:$0xff]  ;;  %v2407_v7 = vld [vmem:[%s4276_s25 + $0xe5] sm:$0xff] }
  0xc1   : > { %v2408_v10 = vld [vmem:[%s4276_s25 + $0xed] sm:$0xff] }
  0xc2   : > { %v2431_v13 = vpack.c.bf16 %v2408_v10, %v2407_v7  ;;  %v1429_v61 = vld [vmem:[%s4276_s25 + $0xd3] sm:$0xff]  ;;  %v1431_v7 = vld [vmem:[%s4276_s25 + $0xe3] sm:$0xff]  ;;  %v1432_v10 = vld [vmem:[%s4276_s25 + $0xeb] sm:$0xff] }
  0xc6   : > { %3652 = vmatmul.mubr.msk.bf16.gmra.mrb[16].mxu1 %vm283_vm1, %v4661_v5  ;;  %3820 = vmatmul.mubr.msk.bf16.gmra.mrb[32].mxu0 %vm283_vm1, %v2110_v6  ;;  %v2429_v6 = vpack.c.bf16 %v2404_v4, %v2403_v3  ;;  %v2729_v3 = vld [vmem:[%s4276_s25 + $0xc6] sm:$0xff]  ;;  %v2730_v4 = vld [vmem:[%s4276_s25 + $0xce] sm:$0xff] }
  0xc7   : > { %3655 = vmatprep.mubr.msk.bf16.mxu1 %vm283_vm1, %v4663_v8  ;;  %3825 = vmatprep.mubr.msk.bf16.mxu0 %vm283_vm1, %v2419_v9  ;;  %v2406_v9 = vld [vmem:[%s4276_s25 + $0xdd] sm:$0xff] }
  0xce   : > { %3656 = vmatmul.mubr.msk.bf16.gmra.mrb[20].mxu1 %vm283_vm1, %v4679_v27  ;;  %3826 = vmatmul.mubr.msk.bf16.vlgmr.msra.gmra.mrb[0].mxu0 %vm283_vm1, %v2420_v29  ;;  %v2416_v29 = vld [vmem:[%s4276_s25 + $0x12d] sm:$0xff] }
  0xcf   : > { %3659 = vmatprep.mubr.msk.bf16.mxu1 %vm283_vm1, %v4681_v20  ;;  %3862 = vmatpush3.bf16.msra.mxu0 %v2820_v22  ;;  %v2435_v22 = vpack.c.bf16 %v2416_v29, %v2415_v23  ;;  %v1435_v23 = vld [vmem:[%s4276_s25 + $0x103] sm:$0xff]  ;;  %v1436_v29 = vld [vmem:[%s4276_s25 + $0x10b] sm:$0xff] }
  0xd0   : > { %3829 = vmatprep.mubr.msk.bf16.mxu0 %vm283_vm1, %v2421_v21 }
  0xd6   : > { %3660 = vmatmul.mubr.msk.bf16.gmra.mrb[24].mxu1 %vm283_vm1, %v4699_v33  ;;  %3830 = vmatmul.mubr.msk.bf16.gmra.mrb[4].mxu0 %vm283_vm1, %v2422_v50  ;;  %v2717_v50 = vld [vmem:[%s4276_s25 + $0x66] sm:$0xff] }
  0xd7   : > { %3663 = vmatprep.mubr.msk.bf16.mxu1 %vm283_vm1, %v4701_v34  ;;  %3833 = vmatprep.mubr.msk.bf16.mxu0 %vm283_vm1, %v2423_v35  ;;  %v2718_v35 = vld [vmem:[%s4276_s25 + $0x6e] sm:$0xff] }
  0xd8   : > { %v2749_v52 = vpack.c.bf16 %v2718_v35, %v2717_v50  ;;  %v1458_v50 = vpack.c.bf16 %v1440_v31, %v1439_v19 }
  0xde   : > { %3664 = vmatmul.mubr.msk.bf16.gmra.mrb[28].mxu1 %vm283_vm1, %v4717_v16  ;;  %3834 = vmatmul.mubr.msk.bf16.gmra.mrb[8].mxu0 %vm283_vm1, %v2424_v46  ;;  %v1425_v46 = vld [vmem:[%s4276_s25 + $0xb3] sm:$0xff] }
  0xdf   : > { %3667 = vmatprep.mubr.msk.bf16.mxu1 %vm283_vm1, %v4719_v30  ;;  %3837 = vmatprep.mubr.msk.bf16.mxu0 %vm283_vm1, %v2425_v48  ;;  %v1426_v48 = vld [vmem:[%s4276_s25 + $0xbb] sm:$0xff] }
  0xe0   : > { %v1451_v43 = vpack.c.bf16 %v1426_v48, %v1425_v46 }
  0xe6   : > { %3668 = vmatmul.mubr.msk.bf16.gmra.mrb[32].mxu1 %vm283_vm1, %v4733_v45  ;;  %3838 = vmatmul.mubr.msk.bf16.gmra.mrb[12].mxu0 %vm283_vm1, %v2426_v60  ;;  %v2727_v60 = vld [vmem:[%s4276_s25 + $0xb6] sm:$0xff] }
  0xe7   : > { %3673 = vmatprep.mubr.msk.bf16.mxu1 %vm283_vm1, %v4589_v41  ;;  %3841 = vmatprep.mubr.msk.bf16.mxu0 %vm283_vm1, %v2427_v57  ;;  %v2405_v41 = vld [vmem:[%s4276_s25 + $0xd5] sm:$0xff]  ;;  %v2728_v57 = vld [vmem:[%s4276_s25 + $0xbe] sm:$0xff] }
  0xe8   : > { %v2430_v11 = vpack.c.bf16 %v2406_v9, %v2405_v41  ;;  %v1453_v41 = vpack.c.bf16 %v1430_v63, %v1429_v61  ;;  %v2755_v9 = vpack.c.bf16 %v2730_v4, %v2729_v3  ;;  %v4902_v63 = vld [vmem:[%s5030_s2] ss:$0 sm:$0xff] }
  0xee   : > { %3674 = vmatmul.mubr.msk.bf16.vlgmr.msra.gmra.mrb[0].mxu1 %vm283_vm1, %v4591_v42  ;;  %3842 = vmatmul.mubr.msk.bf16.gmra.mrb[16].mxu0 %vm283_vm1, %v2428_v59  ;;  %v2410_v42 = vld [vmem:[%s4276_s25 + $0xfd] sm:$0xff] }
  0xef   : > { %3677 = vmatprep.mubr.msk.bf16.mxu1 %vm283_vm1, %v4609_v47  ;;  %3845 = vmatprep.mubr.msk.bf16.mxu0 %vm283_vm1, %v2429_v6  ;;  %v2411_v47 = vld [vmem:[%s4276_s25 + $0x105] sm:$0xff]  ;;  %v2754_v6 = vpack.c.bf16 %v2728_v57, %v2727_v60 }
  0xf0   : > { %3900 = vmatpush3.bf16.msra.mxu1 %v4258_v2  ;;  %v2409_v2 = vld [vmem:[%s4276_s25 + $0xf5] sm:$0xff]  ;;  %v2433_v18 = vpack.c.bf16 %v2412_v15, %v2411_v47  ;;  %v2733_v47 = vld [vmem:[%s4276_s25 + $0xe6] sm:$0xff] }
  0xf1   : > { %v2432_v17 = vpack.c.bf16 %v2410_v42, %v2409_v2  ;;  %v1433_v2 = vld [vmem:[%s4276_s25 + $0xf3] sm:$0xff]  ;;  %v1434_v42 = vld [vmem:[%s4276_s25 + $0xfb] sm:$0xff] }
  0xf2   : > { %v2734_v15 = vld [vmem:[%s4276_s25 + $0xee] sm:$0xff] }
  0xf6   : > { %3678 = vmatmul.mubr.msk.bf16.gmra.mrb[4].mxu1 %vm283_vm1, %v4611_v14  ;;  %3846 = vmatmul.mubr.msk.bf16.gmra.mrb[20].mxu0 %vm283_vm1, %v2430_v11  ;;  %v2413_v14 = vld [vmem:[%s4276_s25 + $0x115] sm:$0xff] }
  0xf7   : > { %3681 = vmatprep.mubr.msk.bf16.mxu1 %vm283_vm1, %v4625_v51  ;;  %3849 = vmatprep.mubr.msk.bf16.mxu0 %vm283_vm1, %v2431_v13  ;;  %v2414_v51 = vld [vmem:[%s4276_s25 + $0x11d] sm:$0xff] }
  0xf8   : > { %v2434_v21 = vpack.c.bf16 %v2414_v51, %v2413_v14  ;;  %v2731_v11 = vld [vmem:[%s4276_s25 + $0xd6] sm:$0xff]  ;;  %v2732_v13 = vld [vmem:[%s4276_s25 + $0xde] sm:$0xff]  ;;  %v1455_v14 = vpack.c.bf16 %v1434_v42, %v1433_v2  ;;  %v2757_v51 = vpack.c.bf16 %v2734_v15, %v2733_v47 }
  0xfe   : > { %3682 = vmatmul.mubr.msk.bf16.gmra.mrb[8].mxu1 %vm283_vm1, %v4627_v53  ;;  %3850 = vmatmul.mubr.msk.bf16.gmra.mrb[24].mxu0 %vm283_vm1, %v2432_v17  ;;  %v2417_v53 = vld [vmem:[%s4276_s25 + $0x135] sm:$0xff]  ;;  %v1454_v17 = vpack.c.bf16 %v1432_v10, %v1431_v7 }
  0xff   : > { %3685 = vmatprep.mubr.msk.bf16.mxu1 %vm283_vm1, %v4641_v56  ;;  %3853 = vmatprep.mubr.msk.bf16.mxu0 %vm283_vm1, %v2433_v18  ;;  %v2418_v56 = vld [vmem:[%s4276_s25 + $0x13d] sm:$0xff]  ;;  %v2756_v18 = vpack.c.bf16 %v2732_v13, %v2731_v11 }
 0x100   : > { %v2436_v24 = vpack.c.bf16 %v2418_v56, %v2417_v53  ;;  %v1437_v53 = vld [vmem:[%s4276_s25 + $0x113] sm:$0xff]  ;;  %v1438_v56 = vld [vmem:[%s4276_s25 + $0x11b] sm:$0xff] }
 0x106   : > { %3686 = vmatmul.mubr.msk.bf16.gmra.mrb[12].mxu1 %vm283_vm1, %v4643_v58  ;;  %3854 = vmatmul.mubr.msk.bf16.gmra.mrb[28].mxu0 %vm283_vm1, %v2434_v21  ;;  %v2711_v58 = vld [vmem:[%s4276_s25 + $0x36] sm:$0xff] }
 0x107   : > { %3689 = vmatprep.mubr.msk.bf16.mxu1 %vm283_vm1, %v4661_v5  ;;  %3857 = vmatprep.mubr.msk.bf16.mxu0 %vm283_vm1, %v2435_v22  ;;  %v2712_v5 = vld [vmem:[%s4276_s25 + $0x3e] sm:$0xff]  ;;  %v2735_v21 = vld [vmem:[%s4276_s25 + $0xf6] sm:$0xff] }
 0x108   : > { %v2746_v26 = vpack.c.bf16 %v2712_v5, %v2711_v58  ;;  %v2736_v22 = vld [vmem:[%s4276_s25 + $0xfe] sm:$0xff]  ;;  %v1457_v58 = vpack.c.bf16 %v1438_v56, %v1437_v53  ;;  %v2759_v5 = vpack.c.bf16 %v2738_v38, %v2737_v25 }
 0x10e   : > { %3690 = vmatmul.mubr.msk.bf16.gmra.mrb[16].mxu1 %vm283_vm1, %v4663_v8  ;;  %3858 = vmatmul.mubr.msk.bf16.gmra.mrb[32].mxu0 %vm283_vm1, %v2436_v24  ;;  %v2715_v8 = vld [vmem:[%s4276_s25 + $0x56] sm:$0xff]  ;;  %v1456_v24 = vpack.c.bf16 %v1436_v29, %v1435_v23 }
 0x10f   : > { %3693 = vmatprep.mubr.msk.bf16.mxu1 %vm283_vm1, %v4679_v27  ;;  %3863 = vmatprep.mubr.msk.bf16.mxu0 %vm283_vm1, %v2745_v28  ;;  %v2716_v27 = vld [vmem:[%s4276_s25 + $0x5e] sm:$0xff]  ;;  %v2758_v28 = vpack.c.bf16 %v2736_v22, %v2735_v21 }
 0x110   : > { %v2748_v36 = vpack.c.bf16 %v2716_v27, %v2715_v8  ;;  %v2741_v8 = vld [vmem:[%s4276_s25 + $0x126] sm:$0xff]  ;;  %v2742_v27 = vld [vmem:[%s4276_s25 + $0x12e] sm:$0xff] }
 0x116   : > { %3694 = vmatmul.mubr.msk.bf16.gmra.mrb[20].mxu1 %vm283_vm1, %v4681_v20  ;;  %3864 = vmatmul.mubr.msk.bf16.vlgmr.msra.gmra.mrb[0].mxu0 %vm283_vm1, %v2746_v26  ;;  %v2719_v20 = vld [vmem:[%s4276_s25 + $0x76] sm:$0xff] }
 0x117   : > { %3697 = vmatprep.mubr.msk.bf16.mxu1 %vm283_vm1, %v4699_v33  ;;  %3867 = vmatprep.mubr.msk.bf16.mxu0 %vm283_vm1, %v2747_v40  ;;  %v2720_v33 = vld [vmem:[%s4276_s25 + $0x7e] sm:$0xff]  ;;  %v2739_v26 = vld [vmem:[%s4276_s25 + $0x116] sm:$0xff] }
 0x118   : > { %v2750_v39 = vpack.c.bf16 %v2720_v33, %v2719_v20  ;;  %v2740_v40 = vld [vmem:[%s4276_s25 + $0x11e] sm:$0xff] }
 0x119   : > { %v2760_v35 = vpack.c.bf16 %v2740_v40, %v2739_v26  ;;  %v2744_v20 = vld [vmem:[%s4276_s25 + $0x13e] sm:$0xff] }
 0x11e   : > { %3698 = vmatmul.mubr.msk.bf16.gmra.mrb[24].mxu1 %vm283_vm1, %v4701_v34  ;;  %3868 = vmatmul.mubr.msk.bf16.gmra.mrb[4].mxu0 %vm283_vm1, %v2748_v36  ;;  %v1113_v34 = vld [vmem:[%s4276_s25 + $0x122] sm:$0xff]  ;;  %v2761_v36 = vpack.c.bf16 %v2742_v27, %v2741_v8 }
 0x11f   : > { %3701 = vmatprep.mubr.msk.bf16.mxu1 %vm283_vm1, %v4717_v16  ;;  %3871 = vmatprep.mubr.msk.bf16.mxu0 %vm283_vm1, %v2749_v52  ;;  %v2724_v16 = vld [vmem:[%s4276_s25 + $0x9e] sm:$0xff]  ;;  %v1132_v49 = vpack.c.bf16 %v1114_v1, %v1113_v34  ;;  %v2743_v52 = vld [vmem:[%s4276_s25 + $0x136] sm:$0xff] }
 0x120   : > { %v2752_v32 = vpack.c.bf16 %v2724_v16, %v2723_v12  ;;  %v2762_v33 = vpack.c.bf16 %v2744_v20, %v2743_v52 }
 0x126   : > { %3702 = vmatmul.mubr.msk.bf16.gmra.mrb[28].mxu1 %vm283_vm1, %v4719_v30  ;;  %3872 = vmatmul.mubr.msk.bf16.gmra.mrb[8].mxu0 %vm283_vm1, %v2750_v39  ;;  %v2725_v30 = vld [vmem:[%s4276_s25 + $0xa6] sm:$0xff] }
 0x127   : > { %3705 = vmatprep.mubr.msk.bf16.mxu1 %vm283_vm1, %v4733_v45  ;;  %3875 = vmatprep.mubr.msk.bf16.mxu0 %vm283_vm1, %v2751_v44  ;;  %v2753_v54 = vpack.c.bf16 %v2726_v0, %v2725_v30  ;;  %v1428_v45 = vld [vmem:[%s4276_s25 + $0xcb] sm:$0xff] }
 0x128   : > { %v1452_v59 = vpack.c.bf16 %v1428_v45, %v1427_v55 }
 0x12e   : > { %3706 = vmatmul.mubr.msk.bf16.gmra.mrb[32].mxu1 %vm283_vm1, %v1132_v49  ;;  %3876 = vmatmul.mubr.msk.bf16.gmra.mrb[12].mxu0 %vm283_vm1, %v2752_v32 }
 0x12f   : > { %3731 = vmatprep.mubr.msk.bf16.mxu1 %vm283_vm1, %v1451_v43  ;;  %3879 = vmatprep.mubr.msk.bf16.mxu0 %vm283_vm1, %v2753_v54 }
 0x136   : > { %3732 = vmatmul.mubr.msk.bf16.vlgmr.msra.gmra.mrb[20].mxu1 %vm283_vm1, %v1452_v59  ;;  %3880 = vmatmul.mubr.msk.bf16.gmra.mrb[16].mxu0 %vm283_vm1, %v2754_v6 }
 0x137   : > { %3735 = vmatprep.mubr.msk.bf16.mxu1 %vm283_vm1, %v1453_v41  ;;  %3883 = vmatprep.mubr.msk.bf16.mxu0 %vm283_vm1, %v2755_v9 }
 0x13e   : > { %3736 = vmatmul.mubr.msk.bf16.gmra.mrb[24].mxu1 %vm283_vm1, %v1454_v17  ;;  %3884 = vmatmul.mubr.msk.bf16.gmra.mrb[20].mxu0 %vm283_vm1, %v2756_v18 }
 0x13f   : > { %3739 = vmatprep.mubr.msk.bf16.mxu1 %vm283_vm1, %v1455_v14  ;;  %3887 = vmatprep.mubr.msk.bf16.mxu0 %vm283_vm1, %v2757_v51 }
 0x146   : > { %3740 = vmatmul.mubr.msk.bf16.gmra.mrb[28].mxu1 %vm283_vm1, %v1456_v24  ;;  %3888 = vmatmul.mubr.msk.bf16.gmra.mrb[24].mxu0 %vm283_vm1, %v2758_v28 }
 0x147   : > { %3743 = vmatprep.mubr.msk.bf16.mxu1 %vm283_vm1, %v1457_v58  ;;  %3891 = vmatprep.mubr.msk.bf16.mxu0 %vm283_vm1, %v2759_v5 }
 0x14e   : > { %3744 = vmatmul.mubr.msk.bf16.gmra.mrb[32].mxu1 %vm283_vm1, %v1458_v50  ;;  %3892 = vmatmul.mubr.msk.bf16.gmra.mrb[28].mxu0 %vm283_vm1, %v2760_v35 }
 0x14f   : > { %3895 = vmatprep.mubr.msk.bf16.mxu0 %vm283_vm1, %v2761_v36 }
 0x156   : > { %3896 = vmatmul.mubr.msk.bf16.gmra.mrb[32].mxu0 %vm283_vm1, %v2762_v33 }
 0x1c1   : > { %v3675_v37 = vpop.f32.mrb[0].mxu1 }
 0x1c2   : > { %v1226_v62 = vpop.f32.mrb[1].mxu1 }
 0x1c3   : > { %v3676_v39 = vpop.f32.mrb[2].mxu1 }
 0x1c4   : > { %v1229_v44 = vpop.f32.mrb[3].mxu1 }
 0x1c9   : > { %v3679_v34 = vpop.f32.mrb[4].mxu1 }
 0x1ca   : > { %v1242_v1 = vpop.f32.mrb[5].mxu1 }
 0x1cb   : > { %v3680_v12 = vpop.f32.mrb[6].mxu1 }
 0x1cc   : > { %v1245_v16 = vpop.f32.mrb[7].mxu1 }
 0x1d1   : > { %v3683_v46 = vpop.f32.mrb[8].mxu1 }
 0x1d2   : > { %v1258_v48 = vpop.f32.mrb[9].mxu1 }
 0x1d3   : > { %v3684_v30 = vpop.f32.mrb[10].mxu1 }
 0x1d4   : > { %v1261_v0 = vpop.f32.mrb[11].mxu1 }
 0x1d9   : > { %v4882_v49 = vpop.f32.mrb[12].mxu1 }
 0x1da   : > { %v4884_v32 = vpop.f32.mrb[13].mxu1 }
 0x1db   : > { %v4886_v43 = vpop.f32.mrb[14].mxu1 }
 0x1dc   : > { %v4888_v54 = vpop.f32.mrb[15].mxu1 }
 0x1e1   : > { %v4890_v55 = vpop.f32.mrb[16].mxu1 }
 0x1e2   : > { %v4892_v45 = vpop.f32.mrb[17].mxu1 }
 0x1e3   : > { %v4894_v60 = vpop.f32.mrb[18].mxu1 }
 0x1e4   : > { %v4896_v57 = vpop.f32.mrb[19].mxu1 }
 0x1e9   : > { %v3865_v61 = vpop.f32.mrb[0].mxu0 }
 0x1ea   : > { %v3901_v3 = vadd.f32 %v3865_v61, %v3675_v37  ;;  %v2856_v4 = vpop.f32.mrb[1].mxu0 }
 0x1eb   : > { %v3902_v59 = vadd.f32 %v2856_v4, %v1226_v62  ;;  %v3866_v6 = vpop.f32.mrb[2].mxu0 }
 0x1ec   : > { %v3044_v41 = vadd.f32 %v3901_v3, %v4902_v63  ;;  %v3903_v9 = vadd.f32 %v3866_v6, %v3676_v39  ;;  %v2859_v7 = vpop.f32.mrb[3].mxu0 }
 0x1ed   : > { %v3042_v10 = vadd.f32 %v3902_v59, %v4902_v63  ;;  %v3904_v11 = vadd.f32 %v2859_v7, %v1229_v44 }
 0x1ee   : > { %v3080_v13 = vmax.f32 %v3044_v41, 0.0  ;;  %v3045_v2 = vadd.f32 %v3903_v9, %v4902_v63 }
 0x1ef   : > { %v3078_v42 = vmax.f32 %v3042_v10, 0.0  ;;  %v3043_v47 = vadd.f32 %v3904_v11, %v4902_v63 }
 0x1f0   : > { %3117 = vst.msk [vmem:[%s4908_s16 + $0x10] sm:$0xff] %vm3114_vm2, %v3080_v13  ;;  %v3081_v15 = vmax.f32 %v3045_v2, 0.0 }
 0x1f1   : > { %3115 = vst.msk [vmem:[%s4908_s16] sm:$0xff] %vm3114_vm2, %v3078_v42  ;;  %v3079_v17 = vmax.f32 %v3043_v47, 0.0  ;;  %v3869_v18 = vpop.f32.mrb[4].mxu0 }
 0x1f2   : > { %3118 = vst.msk [vmem:[%s4908_s16 + $0x18] sm:$0xff] %vm3114_vm2, %v3081_v15  ;;  %v3905_v14 = vadd.f32 %v3869_v18, %v3679_v34  ;;  %v2872_v51 = vpop.f32.mrb[5].mxu0 }
 0x1f3   : > { %3116 = vst.msk [vmem:[%s4908_s16 + $0x8] sm:$0xff] %vm3114_vm2, %v3079_v17  ;;  %v3906_v23 = vadd.f32 %v2872_v51, %v1242_v1  ;;  %v3870_v29 = vpop.f32.mrb[6].mxu0 }
 0x1f4   : > { %v3048_v21 = vadd.f32 %v3905_v14, %v4902_v63  ;;  %v3907_v22 = vadd.f32 %v3870_v29, %v3680_v12  ;;  %v2875_v53 = vpop.f32.mrb[7].mxu0 }
 0x1f5   : > { %v3046_v56 = vadd.f32 %v3906_v23, %v4902_v63  ;;  %v3908_v25 = vadd.f32 %v2875_v53, %v1245_v16 }
 0x1f6   : > { %v3084_v38 = vmax.f32 %v3048_v21, 0.0  ;;  %v3049_v24 = vadd.f32 %v3907_v22, %v4902_v63 }
 0x1f7   : > { %v3082_v28 = vmax.f32 %v3046_v56, 0.0  ;;  %v3047_v58 = vadd.f32 %v3908_v25, %v4902_v63 }
 0x1f8   : > { %3121 = vst.msk [vmem:[%s4908_s16 + $0x30] sm:$0xff] %vm3114_vm2, %v3084_v38  ;;  %v3085_v5 = vmax.f32 %v3049_v24, 0.0 }
 0x1f9   : > { %3119 = vst.msk [vmem:[%s4908_s16 + $0x20] sm:$0xff] %vm3114_vm2, %v3082_v28  ;;  %v3083_v19 = vmax.f32 %v3047_v58, 0.0  ;;  %v3873_v31 = vpop.f32.mrb[8].mxu0 }
 0x1fa   : > { %3122 = vst.msk [vmem:[%s4908_s16 + $0x38] sm:$0xff] %vm3114_vm2, %v3085_v5  ;;  %v3909_v26 = vadd.f32 %v3873_v31, %v3683_v46  ;;  %v2888_v40 = vpop.f32.mrb[9].mxu0 }
 0x1fb   : > { %3120 = vst.msk [vmem:[%s4908_s16 + $0x28] sm:$0xff] %vm3114_vm2, %v3083_v19  ;;  %v3910_v8 = vadd.f32 %v2888_v40, %v1258_v48  ;;  %v3874_v27 = vpop.f32.mrb[10].mxu0 }
 0x1fc   : > { %v3052_v50 = vadd.f32 %v3909_v26, %v4902_v63  ;;  %v3911_v35 = vadd.f32 %v3874_v27, %v3684_v30  ;;  %v2891_v36 = vpop.f32.mrb[11].mxu0 }
 0x1fd   : > { %v3050_v52 = vadd.f32 %v3910_v8, %v4902_v63  ;;  %v3912_v20 = vadd.f32 %v2891_v36, %v1261_v0 }
 0x1fe   : > { %v3088_v33 = vmax.f32 %v3052_v50, 0.0  ;;  %v3053_v37 = vadd.f32 %v3911_v35, %v4902_v63 }
 0x1ff   : > { %v3086_v62 = vmax.f32 %v3050_v52, 0.0  ;;  %v3051_v39 = vadd.f32 %v3912_v20, %v4902_v63 }
 0x200   : > { %3125 = vst.msk [vmem:[%s4908_s16 + $0x50] sm:$0xff] %vm3114_vm2, %v3088_v33  ;;  %v3089_v44 = vmax.f32 %v3053_v37, 0.0 }
 0x201   : > { %3123 = vst.msk [vmem:[%s4908_s16 + $0x40] sm:$0xff] %vm3114_vm2, %v3086_v62  ;;  %v3087_v34 = vmax.f32 %v3051_v39, 0.0  ;;  %v3877_v1 = vpop.f32.mrb[12].mxu0 }
 0x202   : > { %3126 = vst.msk [vmem:[%s4908_s16 + $0x58] sm:$0xff] %vm3114_vm2, %v3089_v44  ;;  %v3913_v12 = vadd.f32 %v3877_v1, %v4882_v49  ;;  %v2904_v16 = vpop.f32.mrb[13].mxu0 }
 0x203   : > { %3124 = vst.msk [vmem:[%s4908_s16 + $0x48] sm:$0xff] %vm3114_vm2, %v3087_v34  ;;  %v3914_v46 = vadd.f32 %v2904_v16, %v4884_v32  ;;  %v3878_v48 = vpop.f32.mrb[14].mxu0 }
 0x204   : > { %v3056_v30 = vadd.f32 %v3913_v12, %v4902_v63  ;;  %v3915_v0 = vadd.f32 %v3878_v48, %v4886_v43  ;;  %v2907_v61 = vpop.f32.mrb[15].mxu0 }
 0x205   : > { %v3054_v3 = vadd.f32 %v3914_v46, %v4902_v63  ;;  %v3916_v4 = vadd.f32 %v2907_v61, %v4888_v54 }
 0x206   : > { %v3092_v59 = vmax.f32 %v3056_v30, 0.0  ;;  %v3057_v49 = vadd.f32 %v3915_v0, %v4902_v63 }
 0x207   : > { %v3090_v6 = vmax.f32 %v3054_v3, 0.0  ;;  %v3055_v41 = vadd.f32 %v3916_v4, %v4902_v63 }
 0x208   : > { %3129 = vst.msk [vmem:[%s4908_s16 + $0x70] sm:$0xff] %vm3114_vm2, %v3092_v59  ;;  %v3093_v32 = vmax.f32 %v3057_v49, 0.0 }
 0x209   : > { %v3733_v9 = vpop.f32.mrb[20].mxu1  ;;  %3127 = vst.msk [vmem:[%s4908_s16 + $0x60] sm:$0xff] %vm3114_vm2, %v3090_v6  ;;  %v3091_v7 = vmax.f32 %v3055_v41, 0.0  ;;  %v3881_v43 = vpop.f32.mrb[16].mxu0 }
 0x20a   : > { %v1632_v10 = vpop.f32.mrb[21].mxu1  ;;  %3130 = vst.msk [vmem:[%s4908_s16 + $0x78] sm:$0xff] %vm3114_vm2, %v3093_v32  ;;  %v3917_v54 = vadd.f32 %v3881_v43, %v4890_v55  ;;  %v2920_v11 = vpop.f32.mrb[17].mxu0 }
 0x20b   : > { %v3734_v13 = vpop.f32.mrb[22].mxu1  ;;  %3128 = vst.msk [vmem:[%s4908_s16 + $0x68] sm:$0xff] %vm3114_vm2, %v3091_v7  ;;  %v3918_v2 = vadd.f32 %v2920_v11, %v4892_v45  ;;  %v3882_v42 = vpop.f32.mrb[18].mxu0 }
 0x20c   : > { %v1635_v47 = vpop.f32.mrb[23].mxu1  ;;  %v3060_v15 = vadd.f32 %v3917_v54, %v4902_v63  ;;  %v3919_v17 = vadd.f32 %v3882_v42, %v4894_v60  ;;  %v2923_v18 = vpop.f32.mrb[19].mxu0 }
 0x20d   : > { %v3058_v14 = vadd.f32 %v3918_v2, %v4902_v63  ;;  %v3920_v55 = vadd.f32 %v2923_v18, %v4896_v57 }
 0x20e   : > { %v3096_v51 = vmax.f32 %v3060_v15, 0.0  ;;  %v3061_v23 = vadd.f32 %v3919_v17, %v4902_v63 }
 0x20f   : > { %v3094_v29 = vmax.f32 %v3058_v14, 0.0  ;;  %v3059_v21 = vadd.f32 %v3920_v55, %v4902_v63 }
 0x210   : > { %3133 = vst.msk [vmem:[%s4908_s16 + $0x90] sm:$0xff] %vm3114_vm2, %v3096_v51  ;;  %v3097_v45 = vmax.f32 %v3061_v23, 0.0 }
 0x211   : > { %v3737_v22 = vpop.f32.mrb[24].mxu1  ;;  %3131 = vst.msk [vmem:[%s4908_s16 + $0x80] sm:$0xff] %vm3114_vm2, %v3094_v29  ;;  %v3095_v53 = vmax.f32 %v3059_v21, 0.0  ;;  %v3885_v60 = vpop.f32.mrb[20].mxu0 }
 0x212   : > { %v1648_v56 = vpop.f32.mrb[25].mxu1  ;;  %3134 = vst.msk [vmem:[%s4908_s16 + $0x98] sm:$0xff] %vm3114_vm2, %v3097_v45  ;;  %v3921_v25 = vadd.f32 %v3885_v60, %v3733_v9  ;;  %v2936_v57 = vpop.f32.mrb[21].mxu0 }
 0x213   : > { %v3738_v38 = vpop.f32.mrb[26].mxu1  ;;  %3132 = vst.msk [vmem:[%s4908_s16 + $0x88] sm:$0xff] %vm3114_vm2, %v3095_v53  ;;  %v3922_v24 = vadd.f32 %v2936_v57, %v1632_v10  ;;  %v3886_v28 = vpop.f32.mrb[22].mxu0 }
 0x214   : > { %v1651_v58 = vpop.f32.mrb[27].mxu1  ;;  %v3064_v5 = vadd.f32 %v3921_v25, %v4902_v63  ;;  %v3923_v19 = vadd.f32 %v3886_v28, %v3734_v13  ;;  %v2939_v31 = vpop.f32.mrb[23].mxu0 }
 0x215   : > { %v3062_v26 = vadd.f32 %v3922_v24, %v4902_v63  ;;  %v3924_v40 = vadd.f32 %v2939_v31, %v1635_v47 }
 0x216   : > { %v3100_v8 = vmax.f32 %v3064_v5, 0.0  ;;  %v3065_v27 = vadd.f32 %v3923_v19, %v4902_v63 }
 0x217   : > { %v3098_v50 = vmax.f32 %v3062_v26, 0.0  ;;  %v3063_v35 = vadd.f32 %v3924_v40, %v4902_v63 }
 0x218   : > { %3137 = vst.msk [vmem:[%s4908_s16 + $0xb0] sm:$0xff] %vm3114_vm2, %v3100_v8  ;;  %v3101_v36 = vmax.f32 %v3065_v27, 0.0 }
 0x219   : > { %v3741_v52 = vpop.f32.mrb[28].mxu1  ;;  %3135 = vst.msk [vmem:[%s4908_s16 + $0xa0] sm:$0xff] %vm3114_vm2, %v3098_v50  ;;  %v3099_v20 = vmax.f32 %v3063_v35, 0.0  ;;  %v3889_v33 = vpop.f32.mrb[24].mxu0 }
 0x21a   : > { %v1664_v37 = vpop.f32.mrb[29].mxu1  ;;  %3138 = vst.msk [vmem:[%s4908_s16 + $0xb8] sm:$0xff] %vm3114_vm2, %v3101_v36  ;;  %v3925_v62 = vadd.f32 %v3889_v33, %v3737_v22  ;;  %v2952_v39 = vpop.f32.mrb[25].mxu0 }
 0x21b   : > { %v3742_v44 = vpop.f32.mrb[30].mxu1  ;;  %3136 = vst.msk [vmem:[%s4908_s16 + $0xa8] sm:$0xff] %vm3114_vm2, %v3099_v20  ;;  %v3926_v34 = vadd.f32 %v2952_v39, %v1648_v56  ;;  %v3890_v1 = vpop.f32.mrb[26].mxu0 }
 0x21c   : > { %v1667_v12 = vpop.f32.mrb[31].mxu1  ;;  %v3068_v16 = vadd.f32 %v3925_v62, %v4902_v63  ;;  %v3927_v46 = vadd.f32 %v3890_v1, %v3738_v38  ;;  %v2955_v48 = vpop.f32.mrb[27].mxu0 }
 0x21d   : > { %v3066_v30 = vadd.f32 %v3926_v34, %v4902_v63  ;;  %v3928_v0 = vadd.f32 %v2955_v48, %v1651_v58 }
 0x21e   : > { %v3104_v61 = vmax.f32 %v3068_v16, 0.0  ;;  %v3069_v3 = vadd.f32 %v3927_v46, %v4902_v63 }
 0x21f   : > { %v3102_v4 = vmax.f32 %v3066_v30, 0.0  ;;  %v3067_v59 = vadd.f32 %v3928_v0, %v4902_v63 }
 0x220   : > { %3141 = vst.msk [vmem:[%s4908_s16 + $0xd0] sm:$0xff] %vm3114_vm2, %v3104_v61  ;;  %v3105_v49 = vmax.f32 %v3069_v3, 0.0 }
 0x221   : > { %v3745_v6 = vpop.f32.mrb[32].mxu1  ;;  %3139 = vst.msk [vmem:[%s4908_s16 + $0xc0] sm:$0xff] %vm3114_vm2, %v3102_v4  ;;  %v3103_v41 = vmax.f32 %v3067_v59, 0.0  ;;  %v3893_v32 = vpop.f32.mrb[28].mxu0 }
 0x222   : > { %v1680_v9 = vpop.f32.mrb[33].mxu1  ;;  %3142 = vst.msk [vmem:[%s4908_s16 + $0xd8] sm:$0xff] %vm3114_vm2, %v3105_v49  ;;  %v3929_v7 = vadd.f32 %v3893_v32, %v3741_v52  ;;  %v2968_v43 = vpop.f32.mrb[29].mxu0 }
 0x223   : > { %v3746_v10 = vpop.f32.mrb[34].mxu1  ;;  %3140 = vst.msk [vmem:[%s4908_s16 + $0xc8] sm:$0xff] %vm3114_vm2, %v3103_v41  ;;  %v3930_v54 = vadd.f32 %v2968_v43, %v1664_v37  ;;  %v3894_v11 = vpop.f32.mrb[30].mxu0 }
 0x224   : > { %v1683_v13 = vpop.f32.mrb[35].mxu1  ;;  %v3072_v2 = vadd.f32 %v3929_v7, %v4902_v63  ;;  %v3931_v42 = vadd.f32 %v3894_v11, %v3742_v44  ;;  %v2971_v47 = vpop.f32.mrb[31].mxu0 }
 0x225   : > { %v3070_v15 = vadd.f32 %v3930_v54, %v4902_v63  ;;  %v3932_v17 = vadd.f32 %v2971_v47, %v1667_v12 }
 0x226   : > { %v3108_v18 = vmax.f32 %v3072_v2, 0.0  ;;  %v3073_v14 = vadd.f32 %v3931_v42, %v4902_v63 }
 0x227   : > { %v3106_v55 = vmax.f32 %v3070_v15, 0.0  ;;  %v3071_v51 = vadd.f32 %v3932_v17, %v4902_v63 }
 0x228   : > { %3145 = vst.msk [vmem:[%s4908_s16 + $0xf0] sm:$0xff] %vm3114_vm2, %v3108_v18  ;;  %v3109_v23 = vmax.f32 %v3073_v14, 0.0 }
 0x229   : > { %3143 = vst.msk [vmem:[%s4908_s16 + $0xe0] sm:$0xff] %vm3114_vm2, %v3106_v55  ;;  %v3107_v29 = vmax.f32 %v3071_v51, 0.0  ;;  %v3897_v21 = vpop.f32.mrb[32].mxu0 }
 0x22a   : > { %3146 = vst.msk [vmem:[%s4908_s16 + $0xf8] sm:$0xff] %vm3114_vm2, %v3109_v23  ;;  %v3933_v45 = vadd.f32 %v3897_v21, %v3745_v6  ;;  %v2984_v22 = vpop.f32.mrb[33].mxu0 }
 0x22b   : > { %3144 = vst.msk [vmem:[%s4908_s16 + $0xe8] sm:$0xff] %vm3114_vm2, %v3107_v29  ;;  %v3934_v53 = vadd.f32 %v2984_v22, %v1680_v9  ;;  %v3898_v60 = vpop.f32.mrb[34].mxu0 }
 0x22c   : > { %v3076_v56 = vadd.f32 %v3933_v45, %v4902_v63  ;;  %v3935_v25 = vadd.f32 %v3898_v60, %v3746_v10  ;;  %v2987_v57 = vpop.f32.mrb[35].mxu0 }
 0x22d   : > { %v3074_v38 = vadd.f32 %v3934_v53, %v4902_v63  ;;  %v3936_v24 = vadd.f32 %v2987_v57, %v1683_v13 }
 0x22e   : > { %v3112_v28 = vmax.f32 %v3076_v56, 0.0  ;;  %v3077_v58 = vadd.f32 %v3935_v25, %v4902_v63 }
 0x22f   : > { %v3110_v5 = vmax.f32 %v3074_v38, 0.0  ;;  %v3075_v19 = vadd.f32 %v3936_v24, %v4902_v63 }
 0x230   : > { %3149 = vst.msk [vmem:[%s4908_s16 + $0x110] sm:$0xff] %vm3114_vm2, %v3112_v28  ;;  %v3113_v31 = vmax.f32 %v3077_v58, 0.0 }
 0x231   : > { %3147 = vst.msk [vmem:[%s4908_s16 + $0x100] sm:$0xff] %vm3114_vm2, %v3110_v5  ;;  %v3111_v26 = vmax.f32 %v3075_v19, 0.0 }
 0x232   : > { %3150 = vst.msk [vmem:[%s4908_s16 + $0x118] sm:$0xff] %vm3114_vm2, %v3113_v31 }
 0x233   : > { %3148 = vst.msk [vmem:[%s4908_s16 + $0x108] sm:$0xff] %vm3114_vm2, %v3111_v26 }
 0x234 PF: > { %s13_s12 = sadd.s32 1, %s4215_s12  }
 0x235   : > { %p10_p4 = scmp.ge.s32.totalorder %s13_s12, 4  }
 0x237   :  { %12 = sbr.rel (!%p10_p4) target bundleno = 1 (0x1), region = 70 }

</bundles_post_ra>
